<compile_context>
chip_gen: v5e
topology: v5e:2x2
jax: 0.10.0
libtpu: 0.0.40
codegen_flags: <defaults>
</compile_context>

<pallas_src>
import functools

import jax
import jax.numpy as jnp
from jax.experimental import pallas as pl
from jax.experimental.pallas import tpu as pltpu


# ---------------------------------------------------------------------------
# Helpers
# ---------------------------------------------------------------------------
def _round_up(v, m):
    return (v + m - 1) // m * m


def _pick_tile(n_padded):
    # n_padded is a multiple of 128; use 256-wide tiles for the 2x256 MXU when
    # they divide evenly and there is more than one tile, else 128.
    if n_padded % 256 == 0 and n_padded > 256:
        return 256
    return 128


def _pick_ktile(f):
    for t in (512, 256, 128):
        if f % t == 0:
            return t
    return f  # fall back to the full (possibly unaligned) feature dim


# ---------------------------------------------------------------------------
# Kernels
# ---------------------------------------------------------------------------
def _gat_proj_kernel(x_ref, w_ref, a_ref, wh_ref, elog_ref, acc_ref):
    """Wh = x @ W (K-tiled); elog = Wh @ [a1 | a2] fused into one MXU pass."""
    k = pl.program_id(1)

    @pl.when(k == 0)
    def _init():
        acc_ref[...] = jnp.zeros(acc_ref.shape, jnp.float32)

    acc_ref[...] += jnp.dot(x_ref[...], w_ref[...],
                            preferred_element_type=jnp.float32)

    @pl.when(k == pl.num_programs(1) - 1)
    def _finalize():
        wh = acc_ref[...]
        wh_ref[...] = wh.astype(wh_ref.dtype)
        elog_ref[...] = jnp.dot(wh, a_ref[...],
                                preferred_element_type=jnp.float32)


def _gat_att_kernel(esrc_ref, edst_ref, whj_ref, adj_ref, out_ref,
                    m_scr, l_scr, acc_scr, *, alpha, n_real, n_pad, tile_n):
    """Flash-style masked-softmax attention: one (tm, tn) tile per grid step."""
    j = pl.program_id(1)

    @pl.when(j == 0)
    def _init():
        m_scr[...] = jnp.full(m_scr.shape, -jnp.inf, jnp.float32)
        l_scr[...] = jnp.zeros(l_scr.shape, jnp.float32)
        acc_scr[...] = jnp.zeros(acc_scr.shape, jnp.float32)

    # e[i, c] = leakyrelu(Wh[i]·a1 + Wh[c]·a2): (tm,1) + (1,tn) broadcast add.
    e = esrc_ref[...] + edst_ref[...]
    e = jnp.where(e > 0, e, alpha * e)                   # LeakyReLU(alpha)
    e = jnp.where(adj_ref[...] > 0, e, -9.0e15)          # same constant as torch
    if n_pad != n_real:                                  # mask padded columns
        col = tile_n * j + jax.lax.broadcasted_iota(jnp.int32, e.shape, 1)
        e = jnp.where(col < n_real, e, -jnp.inf)

    # Online softmax update.
    m_prev = m_scr[...]
    m_new = jnp.maximum(m_prev, jnp.max(e, axis=1, keepdims=True))
    scale = jnp.exp(m_prev - m_new)
    p = jnp.exp(e - m_new)
    l_scr[...] = scale * l_scr[...] + jnp.sum(p, axis=1, keepdims=True)
    acc_scr[...] = scale * acc_scr[...] + jnp.dot(
        p, whj_ref[...], preferred_element_type=jnp.float32)
    m_scr[...] = m_new
    # TODO(synk): attention dropout (p=0.1, training=True) not applied here.

    @pl.when(j == pl.num_programs(1) - 1)
    def _finalize():
        # 1/l folded into the once-per-row-tile finalize (flash formulation).
        out_ref[...] = (acc_scr[...] *
                        pl.reciprocal(l_scr[...], approx=False)
                        ).astype(out_ref.dtype)


def _gat_noatt_kernel(adj_ref, wh_ref, out_ref, acc_ref):
    """Tiled out = adj @ Wh with a VMEM accumulator over column tiles."""
    j = pl.program_id(1)

    @pl.when(j == 0)
    def _init():
        acc_ref[...] = jnp.zeros(acc_ref.shape, jnp.float32)

    acc_ref[...] += jnp.dot(adj_ref[...], wh_ref[...],
                            preferred_element_type=jnp.float32)

    @pl.when(j == pl.num_programs(1) - 1)
    def _finalize():
        out_ref[...] = acc_ref[...].astype(out_ref.dtype)


# ---------------------------------------------------------------------------
# Wrapper
# ---------------------------------------------------------------------------
def gat_forward(x, adj, W, a, *, alpha=0.0, do_att=False):
    """Pallas GAT forward. x:(N,F) adj:(N,N) W:(F,H) a:(2H,1) -> (N,H) float32."""
    x = x.astype(jnp.float32)
    adj = adj.astype(jnp.float32)
    W = W.astype(jnp.float32)
    a = a.astype(jnp.float32)

    N, F = x.shape
    H = W.shape[1]
    Np = _round_up(N, 128)                 # (8,128)-aligned node dim
    Hp = max(128, _round_up(H, 128))       # lane-dense hidden dim
    tm = _pick_tile(Np)
    tn = _pick_tile(Np)
    tf = _pick_ktile(F)

    # ---- wrapper-side layout plumbing (zero pads; tiny vs N^2 work) ---------
    x_p = x if Np == N else jnp.pad(x, ((0, Np - N), (0, 0)))
    adj_p = adj if Np == N else jnp.pad(adj, ((0, Np - N), (0, Np - N)))
    W_p = jnp.zeros((F, Hp), jnp.float32).at[:, :H].set(W)
    a_pair = jnp.zeros((Hp, 2), jnp.float32)
    a_pair = a_pair.at[:H, 0].set(a[:H, 0]).at[:H, 1].set(a[H:2 * H, 0])

    vmem_limit = 32 * 1024 * 1024
    mib = 1024 * 1024  # silence linters; unused
    del mib

    # ---- 1) projection: Wh (Np,Hp) and fused logits elog (Np,2) -------------
    wh, elog = pl.pallas_call(
        _gat_proj_kernel,
        out_shape=(jax.ShapeDtypeStruct((Np, Hp), jnp.float32),
                   jax.ShapeDtypeStruct((Np, 2), jnp.float32)),
        grid_spec=pltpu.PrefetchScalarGridSpec(
            num_scalar_prefetch=0,
            grid=(Np // tm, F // tf),
            in_specs=[
                pl.BlockSpec((tm, tf), lambda i, k: (i, k)),   # x row/K block
                pl.BlockSpec((tf, Hp), lambda i, k: (k, 0)),   # W K block
                pl.BlockSpec((Hp, 2), lambda i, k: (0, 0)),    # [a1 | a2]
            ],
            out_specs=(pl.BlockSpec((tm, Hp), lambda i, k: (i, 0)),
                       pl.BlockSpec((tm, 2), lambda i, k: (i, 0))),
            scratch_shapes=[pltpu.VMEM((tm, Hp), jnp.float32)]),
        compiler_params=pltpu.CompilerParams(
            dimension_semantics=("parallel", "arbitrary"),
            vmem_limit_bytes=vmem_limit),
        cost_estimate=pl.CostEstimate(
            flops=2 * Np * F * Hp + 4 * Np * Hp,
            transcendentals=0,
            bytes_accessed=4 * (Np * F + F * Hp + Np * Hp + 2 * Np)),
    )(x_p, W_p, a_pair)

    if do_att:
        e_src = elog[:, 0:1]                     # (Np, 1) source logits
        e_dst = elog[:, 1:2].reshape(1, Np)      # lane-dense (1, Np) dest logits

        out_p = pl.pallas_call(
            functools.partial(_gat_att_kernel, alpha=float(alpha),
                              n_real=N, n_pad=Np, tile_n=tn),
            out_shape=jax.ShapeDtypeStruct((Np, Hp), jnp.float32),
            grid_spec=pltpu.PrefetchScalarGridSpec(
                num_scalar_prefetch=0,
                grid=(Np // tm, Np // tn),
                in_specs=[
                    pl.BlockSpec((tm, 1), lambda i, j: (i, 0)),    # e_src rows
                    pl.BlockSpec((1, tn), lambda i, j: (0, j)),    # e_dst cols
                    pl.BlockSpec((tn, Hp), lambda i, j: (j, 0)),   # Wh col blk
                    pl.BlockSpec((tm, tn), lambda i, j: (i, j)),   # adj tile
                ],
                out_specs=pl.BlockSpec((tm, Hp), lambda i, j: (i, 0)),
                scratch_shapes=[pltpu.VMEM((tm, 1), jnp.float32),    # running max
                                pltpu.VMEM((tm, 1), jnp.float32),    # running sum
                                pltpu.VMEM((tm, Hp), jnp.float32)]), # accumulator
            compiler_params=pltpu.CompilerParams(
                dimension_semantics=("parallel", "arbitrary"),
                vmem_limit_bytes=vmem_limit),
            cost_estimate=pl.CostEstimate(
                flops=2 * Np * Np * Hp + 6 * Np * Np,
                transcendentals=Np * Np,
                bytes_accessed=4 * (Np * Np + 2 * Np * Hp + 2 * Np)),
        )(e_src, e_dst, wh, adj_p)
    else:
        out_p = pl.pallas_call(
            _gat_noatt_kernel,
            out_shape=jax.ShapeDtypeStruct((Np, Hp), jnp.float32),
            grid_spec=pltpu.PrefetchScalarGridSpec(
                num_scalar_prefetch=0,
                grid=(Np // tm, Np // tn),
                in_specs=[
                    pl.BlockSpec((tm, tn), lambda i, j: (i, j)),   # adj tile
                    pl.BlockSpec((tn, Hp), lambda i, j: (j, 0)),   # Wh col blk
                ],
                out_specs=pl.BlockSpec((tm, Hp), lambda i, j: (i, 0)),
                scratch_shapes=[pltpu.VMEM((tm, Hp), jnp.float32)]),
            compiler_params=pltpu.CompilerParams(
                dimension_semantics=("parallel", "arbitrary"),
                vmem_limit_bytes=vmem_limit),
            cost_estimate=pl.CostEstimate(
                flops=2 * Np * Np * Hp,
                transcendentals=0,
                bytes_accessed=4 * (Np * Np + 2 * Np * Hp)),
        )(adj_p, wh)

    return out_p[:N, :H]


# ---------------------------------------------------------------------------
# Deterministic parameter init (xavier_uniform, gain=1.414) + demo
# ---------------------------------------------------------------------------
def xavier_uniform(key, shape, gain):
    fan_in, fan_out = shape[0], shape[1]
    bound = gain * jnp.sqrt(6.0 / (fan_in + fan_out))
    return jax.random.uniform(key, shape, jnp.float32, -bound, bound)


def _reference(x, adj, W, a, alpha, do_att):
    H = W.shape[1]
    wh = x @ W
    if not do_att:
        return adj @ wh
    e = wh @ a[:H] + (wh @ a[H:]).T
    e = jnp.where(e > 0, e, alpha * e)
    att = jax.nn.softmax(jnp.where(adj > 0, e, -9.0e15), axis=1)
    return att @ wh


if __name__ == "__main__":
    # High-precision reference matmuls for the self-check.
    jax.config.update("jax_default_matmul_precision", "highest")

    alpha = 0.0  # GAT builds GraphAttentionLayer with alpha=0.0

    configs = [
        (256, 128, 32),   # aligned: exercises multi-tile online softmax (2x2 grid)
        (200, 96, 64),    # unaligned: exercises N/F padding + column masking
    ]

    key = jax.random.PRNGKey(0)
    for (N, nfeat, nhid) in configs:
        key, k_x, k_adj, k_w, k_a = jax.random.split(key, 5)

        x = jax.random.normal(k_x, (N, nfeat), jnp.float32)
        # Random binary adjacency (~30% density) with self loops.
        adj = (jax.random.uniform(k_adj, (N, N)) > 0.7).astype(jnp.float32)
        adj = jnp.maximum(adj, jnp.eye(N, dtype=jnp.float32))

        W = xavier_uniform(k_w, (nfeat, nhid), gain=1.414)
        a = xavier_uniform(k_a, (2 * nhid, 1), gain=1.414)

        for do_att in (False, True):
            out = gat_forward(x, adj, W, a, alpha=alpha, do_att=do_att)
            out = jax.block_until_ready(out)
            ref = _reference(x, adj, W, a, alpha, do_att)

            assert out.shape == (N, nhid)
            assert not bool(jnp.any(jnp.isnan(out)))
            max_err = float(jnp.max(jnp.abs(out - ref)))
            assert jnp.allclose(out, ref, atol=1e-3, rtol=1e-3), (
                f"mismatch N={N} do_att={do_att}: max abs err {max_err}")

    print("KERNEL_OK")
</pallas_src>

<mosaic_0001>
module attributes {stable_mosaic.version = 11 : i64} {
  func.func @_gat_proj_kernel(%arg0: i32, %arg1: i32, %arg2: memref<128x128xf32, #tpu.memory_space<vmem>>, %arg3: memref<128x128xf32, #tpu.memory_space<vmem>>, %arg4: memref<128x2xf32, #tpu.memory_space<vmem>>, %arg5: memref<128x128xf32, #tpu.memory_space<vmem>>, %arg6: memref<128x2xf32, #tpu.memory_space<vmem>>, %arg7: memref<128x128xf32, #tpu.memory_space<vmem>>) attributes {dimension_semantics = [#tpu.dimension_semantics<parallel>, #tpu.dimension_semantics<arbitrary>], iteration_bounds = array<i64: 2, 1>, scalar_prefetch = 0 : i64, scratch_operands = 1 : i64, tpu.core_type = #tpu.core_type<tc>, window_params = [{transform_indices = @transform_0, window_bounds = array<i64: 128, 128>}, {transform_indices = @transform_1, window_bounds = array<i64: 128, 128>}, {pipeline_mode = #tpu.pipeline_mode<synchronous>, transform_indices = @transform_2, window_bounds = array<i64: 128, 2>}, {transform_indices = @transform_3, window_bounds = array<i64: 128, 128>}, {transform_indices = @transform_4, window_bounds = array<i64: 128, 2>}]} {
    %c0_i32 = arith.constant 0 : i32
    %0 = arith.cmpi eq, %arg1, %c0_i32 : i32
    %1 = arith.extui %0 : i1 to i32
    %c0_i32_0 = arith.constant 0 : i32
    %2 = arith.cmpi ne, %1, %c0_i32_0 : i32
    scf.if %2 {
      %cst_10 = arith.constant 0.000000e+00 : f32
      %12 = vector.broadcast %cst_10 : f32 to vector<128x128xf32>
      %c0_11 = arith.constant 0 : index
      %c0_12 = arith.constant 0 : index
      %13 = vector.load %arg7[%c0_11, %c0_12] : memref<128x128xf32, #tpu.memory_space<vmem>>, vector<128x128xf32>
      tpu.vector_store %arg7[%c0_11, %c0_12], %12 {strides = array<i32>} : memref<128x128xf32, #tpu.memory_space<vmem>>, vector<128x128xf32>,
    } else {
    }
    %c0 = arith.constant 0 : index
    %c0_1 = arith.constant 0 : index
    %3 = vector.load %arg7[%c0, %c0_1] : memref<128x128xf32, #tpu.memory_space<vmem>>, vector<128x128xf32>
    %c0_2 = arith.constant 0 : index
    %c0_3 = arith.constant 0 : index
    %4 = vector.load %arg2[%c0_2, %c0_3] : memref<128x128xf32, #tpu.memory_space<vmem>>, vector<128x128xf32>
    %c0_4 = arith.constant 0 : index
    %c0_5 = arith.constant 0 : index
    %5 = vector.load %arg3[%c0_4, %c0_5] : memref<128x128xf32, #tpu.memory_space<vmem>>, vector<128x128xf32>
    %cst = arith.constant dense<0.000000e+00> : vector<128x128xf32>
    %6 = tpu.matmul %4, %5, %cst {dimension_numbers = #tpu.dot_dimension_numbers<[1], [0], [0], [1], [0, 0, 1, 1], [], []>, precision = #tpu.contract_precision<fp32>} : vector<128x128xf32>, vector<128x128xf32>, vector<128x128xf32> -> vector<128x128xf32>
    %7 = arith.addf %3, %6 : vector<128x128xf32>
    %c0_6 = arith.constant 0 : index
    %c0_7 = arith.constant 0 : index
    %8 = vector.load %arg7[%c0_6, %c0_7] : memref<128x128xf32, #tpu.memory_space<vmem>>, vector<128x128xf32>
    tpu.vector_store %arg7[%c0_6, %c0_7], %7 {strides = array<i32>} : memref<128x128xf32, #tpu.memory_space<vmem>>, vector<128x128xf32>,
    %c0_i32_8 = arith.constant 0 : i32
    %9 = arith.cmpi eq, %arg1, %c0_i32_8 : i32
    %10 = arith.extui %9 : i1 to i32
    %c0_i32_9 = arith.constant 0 : i32
    %11 = arith.cmpi ne, %10, %c0_i32_9 : i32
    scf.if %11 {
      %c0_10 = arith.constant 0 : index
      %c0_11 = arith.constant 0 : index
      %12 = vector.load %arg7[%c0_10, %c0_11] : memref<128x128xf32, #tpu.memory_space<vmem>>, vector<128x128xf32>
      %c0_12 = arith.constant 0 : index
      %c0_13 = arith.constant 0 : index
      %13 = vector.load %arg5[%c0_12, %c0_13] : memref<128x128xf32, #tpu.memory_space<vmem>>, vector<128x128xf32>
      tpu.vector_store %arg5[%c0_12, %c0_13], %12 {strides = array<i32>} : memref<128x128xf32, #tpu.memory_space<vmem>>, vector<128x128xf32>,
      %c0_14 = arith.constant 0 : index
      %c0_15 = arith.constant 0 : index
      %14 = vector.load %arg4[%c0_14, %c0_15] : memref<128x2xf32, #tpu.memory_space<vmem>>, vector<128x2xf32>
      %cst_16 = arith.constant dense<0.000000e+00> : vector<128x2xf32>
      %15 = tpu.matmul %12, %14, %cst_16 {dimension_numbers = #tpu.dot_dimension_numbers<[1], [0], [0], [1], [0, 0, 1, 1], [], []>, precision = #tpu.contract_precision<fp32>} : vector<128x128xf32>, vector<128x2xf32>, vector<128x2xf32> -> vector<128x2xf32>
      %c0_17 = arith.constant 0 : index
      %c0_18 = arith.constant 0 : index
      %16 = vector.load %arg6[%c0_17, %c0_18] : memref<128x2xf32, #tpu.memory_space<vmem>>, vector<128x2xf32>
      tpu.vector_store %arg6[%c0_17, %c0_18], %15 {strides = array<i32>} : memref<128x2xf32, #tpu.memory_space<vmem>>, vector<128x2xf32>,
    } else {
    }
    return
  }
  func.func @transform_0(%arg0: i32, %arg1: i32) -> (i32, i32) {
    %c0_i32 = arith.constant 0 : i32
    return %arg0, %arg1 : i32, i32
  }
  func.func @transform_1(%arg0: i32, %arg1: i32) -> (i32, i32) {
    %c0_i32 = arith.constant 0 : i32
    %c0_i32_0 = arith.constant 0 : i32
    return %arg1, %c0_i32 : i32, i32
  }
  func.func @transform_2(%arg0: i32, %arg1: i32) -> (i32, i32) {
    %c0_i32 = arith.constant 0 : i32
    %c0_i32_0 = arith.constant 0 : i32
    %c0_i32_1 = arith.constant 0 : i32
    return %c0_i32, %c0_i32_0 : i32, i32
  }
  func.func @transform_3(%arg0: i32, %arg1: i32) -> (i32, i32) {
    %c0_i32 = arith.constant 0 : i32
    %c0_i32_0 = arith.constant 0 : i32
    return %arg0, %c0_i32 : i32, i32
  }
  func.func @transform_4(%arg0: i32, %arg1: i32) -> (i32, i32) {
    %c0_i32 = arith.constant 0 : i32
    %c0_i32_0 = arith.constant 0 : i32
    return %arg0, %c0_i32 : i32, i32
  }
}

</mosaic_0001>

<bundles_post_ra>
// kernel: tpu_custom_call.1
= control target key start
LH: loop header
LB: loop body
LE: loop exit
PB: predicated region body
PF: predicated region fallthrough
CT: control target
= control target key end

     0   :  { %10 = vsyncpa [#allocation4], 0  ;;  %s3545_s0 = inlined_call_operand.hbm [shape: f32[256,128], index: 0, kind: input, shape index: {}]   ;;  %s3546_s1 = inlined_call_operand.vmem [shape: f32[128,128], index: 1, kind: input, shape index: {}]   ;;  %s3547_s2 = inlined_call_operand.vmem [shape: f32[128,2], index: 2, kind: input, shape index: {}]   ;;  %s3548_s3 = inlined_call_operand.hbm [shape: f32[256,128], index: 3, kind: output, shape index: {0}]   ;;  %s3549_s4 = inlined_call_operand.vmem [shape: f32[256,2], index: 4, kind: output, shape index: {1}]  }
   0x1   :  { %12 = vsyncpa [#allocation4 + $0x1], 0 }
   0x2   :  { %13 = vsyncpa [#allocation5], 0 }
   0x3   :  { %15 = vsyncpa [#allocation5 + $0x1], 0  ;;  %s2428_s15 = smov 0   ;;  %s2430_s16 = smov 0  }
   0x4   :  { %s2432_s17 = smov 0   ;;  %s2434_s18 = smov 0  }
   0x5   :  { %s2436_s19 = smov 0   ;;  %s2438_s20 = smov 0  }
   0x6 LB: > { %s2199_s21 = sadd.s32 4294967295, %s2397_s20   ;;  %s2200_s22 = sadd.s32 4294967294, %s2397_s20   ;;  %s2397_s20 = sphi %s2438_s20, %s21_s20   ;;  %s2393_s19 = sphi %s2436_s19, %s3612_s19   ;;  %s2389_s18 = sphi %s2434_s18, %s3611_s18   ;;  %s2385_s17 = sphi %s2432_s17, %s3610_s17   ;;  %s2381_s16 = sphi %s2430_s16, %s3609_s16   ;;  %s2377_s15 = sphi %s2428_s15, %s3608_s15  }
   0x7   : > { %s33_s23 = sadd.s32 1, %s2393_s19  ;;  %s42_s24 = sadd.s32 1, %s2385_s17 }
   0x8   : > { %p35_p0 = scmp.ge.s32.totalorder %s33_s23, 2  ;;  %p49_p1 = scmp.ne.s32.totalorder %s2385_s17, %s2381_s16 }
   0x9   : > { %p50_p2 = scmp.eq.s32.totalorder %s2397_s20, 0  ;;  %p55_p3 = scmp.ne.s32.totalorder %s2381_s16, %s2377_s15 }
   0xa   : > { %s3614_s23 = smov (%p35_p0, %s33_s23), 0  ;;  %p56_p5 = scmp.eq.s32.totalorder %s2199_s21, 0 }
   0xb   : > { %p2469_p4 = por %p50_p2, %p49_p1  ;;  %s37_s26 = ssub.s32 %s2393_s19, %s3614_s23 }
   0xc   : > { %p126_p6 = scmp.eq.s32.totalorder %s2199_s21, 1  ;;  %p40_p7 = scmp.eq.s32.totalorder %s37_s26, 0 }
   0xd   : > { %p2475_p8 = por %p56_p5, %p55_p3  ;;  %p132_p10 = scmp.eq.s32.totalorder %s2200_s22, 1 }
   0xe   : > { %p2479_p9 = por %p126_p6, %p49_p1  ;;  %p2203_p12 = scmp.ge.s32.totalorder %s2397_s20, 2 }
   0xf   : > { %s2484_s29 = scalar_select %p40_p7, %s2385_s17, %s42_s24  }
  0x10   : > { %p2486_p11 = por %p132_p10, %p55_p3  ;;  %p2231_p13 = scmp.lt.s32.totalorder %s2397_s20, 2 }
  0x11   : > { %s190_s5 = sand.u32 1, %s2385_s17   ;;  %s2217_s7 = sshll.u32 %s2393_s19, 7 }
  0x12   : > { %s2204_s6 = sshll.u32 %s190_s5, 7  ;;  %s200_s10 = scalar_lea.hbm %s3545_s0, %s2217_s7 }
  0x13   : > { %s194_s11 = scalar_lea.vmem [#allocation3], %s2204_s6  ;;  %s201_s13 = sshll.u32 %s200_s10, 4  ;;  %s202_s13 = int_to_ptr.hbm [resolvable:$true] %s201_s13 }
  0x14   : > { %s203_s12 = sshll.u32 %s194_s11, 4  ;;  %p2224_p0 = pnand %p2231_p13, %p2469_p4  ;;  %s204_s12 = int_to_ptr.vmem [resolvable:$true] %s203_s12 }
  0x15   : > { %p2207_p1 = scmp.ge.s32.totalorder %s2397_s20, 1  ;;  %s191_s14 = scalar_lea.sflag [#allocation4], %s190_s5 }
  0x16   : > { %s2399_s21 = smov 128   ;;  %s2400_s22 = smov 8  }
  0x17   : > { %2226 = dma.hbm_to_vmem [thread:$0]  (!%p2224_p0), %s202_s13, 2048, %s204_s12, %s191_s14, %s2399_s21, %s2399_s21, %s2400_s22  }
  0x18   : > { %p211_p2 = scmp.lt.s32.totalorder %s2397_s20, 3 }
  0x1a   : > { %p212_p3 = pnand %p2207_p1, %p211_p2 }
  0x1c   : > { %215 = sbr.rel (%p212_p3) target bundleno = 730 (0x2da), region = 32 }
  0x21   : > { %s2502_s24 = sand.u32 1, %s2381_s16  }
  0x22   : > { %s2208_s26 = sshll.u32 %s2502_s24, 7  ;;  %s218_s6 = scalar_lea.sflag [#allocation4], %s2502_s24 }
  0x23   : > { %s2508_s25 = scalar_lea.vmem [#allocation3], %s2208_s26 }
  0x24   : > { %2368 = dma.done.wait (%p2475_p8), %s218_s6, 2048  }
  0x25   : > { %2370 = vsyncadd (%p2475_p8), %s218_s6, 4294965248  ;;  %v338_v0 = vld [vmem:[%s3546_s1 + $0x78] sm:$0xff]  ;;  %v337_v1 = vld [vmem:[%s3546_s1 + $0x70] sm:$0xff]  ;;  %s3274_s14 = scalar_lea.vmem [#allocation6], %s2208_s26  ;;  %s2210_s26 = sshll.u32 %s2389_s18, 4 }
  0x26   : > { %v336_v2 = vld [vmem:[%s3546_s1 + $0x68] sm:$0xff]  ;;  %v2523_v3 = vand.u32 4294901760, %v338_v0  ;;  %v2525_v4 = vand.u32 4294901760, %v337_v1  ;;  %v335_v6 = vld [vmem:[%s3546_s1 + $0x60] sm:$0xff]  ;;  %v334_v7 = vld [vmem:[%s3546_s1 + $0x58] sm:$0xff]  ;;  %p266_p4 = scmp.lt.s32.totalorder %s2210_s26, 31 }
  0x27   : > { %v2527_v5 = vand.u32 4294901760, %v336_v2  ;;  %v333_v8 = vld [vmem:[%s3546_s1 + $0x50] sm:$0xff]  ;;  %v2538_v9 = vand.u32 4294901760, %v335_v6  ;;  %v2540_v10 = vand.u32 4294901760, %v334_v7  ;;  %v332_v12 = vld [vmem:[%s3546_s1 + $0x48] sm:$0xff]  ;;  %v331_v13 = vld [vmem:[%s3546_s1 + $0x40] sm:$0xff] }
  0x28   : > { %v2542_v11 = vand.u32 4294901760, %v333_v8  ;;  %340 = vmatpush.msra.mxu0 %v2523_v3  ;;  %v2552_v14 = vsub.f32 %v338_v0, %v2523_v3  ;;  %v2555_v15 = vsub.f32 %v337_v1, %v2525_v4  ;;  %791 = vmatpush.msra.mxu3 %v2523_v3  ;;  %v2561_v17 = vand.u32 4294901760, %v332_v12  ;;  %v330_v18 = vld [vmem:[%s3546_s1 + $0x38] sm:$0xff]  ;;  %v329_v29 = vld [vmem:[%s3546_s1 + $0x30] sm:$0xff]  ;;  %v328_v36 = vld [vmem:[%s3546_s1 + $0x28] sm:$0xff]  ;;  %s3616_s26 = smov (!%p266_p4, %s2210_s26), 31 }
  0x29   : > { %v2559_v16 = vsub.f32 %v336_v2, %v2527_v5  ;;  %v2567_v19 = vsub.f32 %v335_v6, %v2538_v9  ;;  %v2570_v20 = vsub.f32 %v334_v7, %v2540_v10  ;;  %v2572_v21 = vand.u32 4294901760, %v331_v13  ;;  %v327_v43 = vld [vmem:[%s3546_s1 + $0x20] sm:$0xff]  ;;  %v326_v49 = vld [vmem:[%s3546_s1 + $0x18] sm:$0xff]  ;;  %v325_v55 = vld [vmem:[%s3546_s1 + $0x10] sm:$0xff]  ;;  %s2218_s21 = sshll.u32 %s2389_s18, 7  ;;  %s2069_s7 = sshll.u32 %s3274_s14, 4  ;;  %s2070_s7 = int_to_ptr.vmem [resolvable:$true] %s2069_s7 }
  0x2a   : > { %v2575_v22 = vsub.f32 %v333_v8, %v2542_v11  ;;  %342 = vmatpush.msra.mxu0 %v2525_v4  ;;  %663 = vmatpush.msra.mxu2 %v2552_v14  ;;  %v502_v23 = vand.u32 4294901760, %v2552_v14  ;;  %v508_v24 = vand.u32 4294901760, %v2555_v15  ;;  %v2584_v27 = vand.u32 4294901760, %v330_v18  ;;  %v307_v56 = vld [vmem:[%s2508_s25] sm:$0xff]  ;;  %v324_v62 = vld [vmem:[%s3546_s1 + $0x8] sm:$0xff]  ;;  %s2068_s5 = scalar_lea.hbm %s3548_s3, %s2218_s21  ;;  %s2211_s9 = sshll.u32 %s3616_s26, 3 }
  0x2b   : > { %v514_v25 = vand.u32 4294901760, %v2559_v16  ;;  %793 = vmatpush.msra.mxu3 %v2525_v4  ;;  %v520_v26 = vand.u32 4294901760, %v2567_v19  ;;  %v2587_v28 = vsub.f32 %v332_v12, %v2561_v17  ;;  %v526_v33 = vand.u32 4294901760, %v2570_v20  ;;  %v323_v8 = vld [vmem:[%s3546_s1] sm:$0xff]  ;;  %s2071_s8 = sshll.u32 %s2068_s5, 4  ;;  %s2052_s10 = scalar_lea.sflag [#allocation5], %s2502_s24  ;;  %s2072_s8 = int_to_ptr.hbm [resolvable:$true] %s2071_s8 }
  0x2c   : > { %344 = vmatpush.msra.mxu0 %v2527_v5  ;;  %666 = vmatpush.msra.mxu2 %v2555_v15  ;;  %v503_v30 = vsub.f32 %v2552_v14, %v502_v23  ;;  %v509_v31 = vsub.f32 %v2555_v15, %v508_v24  ;;  %v532_v34 = vand.u32 4294901760, %v2575_v22  ;;  %v2607_v35 = vsub.f32 %v331_v13, %v2572_v21  ;;  %v311_v14 = vld [vmem:[%s2508_s25 + $0x20] sm:$0xff]  ;;  %s2329_s11 = sshra.s32 %s2072_s8, 4  ;;  %s2335_s12 = scalar_lea.hbm %s3548_s3, 256  ;;  %s2330_s11 = int_to_ptr.hbm [resolvable:$true] %s2329_s11 }
  0x2d   : > { %v515_v32 = vsub.f32 %v2559_v16, %v514_v25  ;;  %795 = vmatpush.msra.mxu3 %v2527_v5  ;;  %v521_v39 = vsub.f32 %v2567_v19, %v520_v26  ;;  %v2617_v40 = vand.u32 4294901760, %v329_v29  ;;  %v538_v41 = vand.u32 4294901760, %v2587_v28  ;;  %p2336_p8 = scmp.lt.s32.totalorder %s2330_s11, %s3548_s3 }
  0x2e   : > { %346 = vmatpush.msra.mxu0 %v2538_v9  ;;  %v504_v37 = vand.u32 4294901760, %v503_v30  ;;  %669 = vmatpush.msra.mxu2 %v2559_v16  ;;  %v510_v38 = vand.u32 4294901760, %v509_v31  ;;  %v2622_v42 = vsub.f32 %v330_v18, %v2584_v27  ;;  %v527_v45 = vsub.f32 %v2570_v20, %v526_v33  ;;  %v308_v30 = vld [vmem:[%s2508_s25 + $0x8] sm:$0xff] }
  0x2f   : > { %797 = vmatpush.msra.mxu3 %v2538_v9  ;;  %v516_v44 = vand.u32 4294901760, %v515_v32  ;;  %v2631_v46 = vand.u32 4294901760, %v328_v36  ;;  %v533_v47 = vsub.f32 %v2575_v22, %v532_v34  ;;  %v544_v48 = vand.u32 4294901760, %v2607_v35  ;;  %v312_v16 = vld [vmem:[%s2508_s25 + $0x28] sm:$0xff] }
  0x30   : > { %348 = vmatpush.msra.mxu0 %v2540_v10  ;;  %505 = vmatpush.msra.mxu1 %v504_v37  ;;  %v522_v50 = vand.u32 4294901760, %v521_v39  ;;  %v2643_v51 = vand.u32 4294901760, %v327_v43  ;;  %v2646_v52 = vsub.f32 %v329_v29, %v2617_v40  ;;  %v539_v53 = vsub.f32 %v2587_v28, %v538_v41 }
  0x31   : > { %672 = vmatpush.msra.mxu2 %v2567_v19  ;;  %799 = vmatpush.msra.mxu3 %v2540_v10  ;;  %v550_v54 = vand.u32 4294901760, %v2622_v42  ;;  %v528_v57 = vand.u32 4294901760, %v527_v45  ;;  %v2659_v58 = vand.u32 4294901760, %v326_v49  ;;  %v2662_v59 = vsub.f32 %v328_v36, %v2631_v46 }
  0x32   : > { %350 = vmatpush.msra.mxu0 %v2542_v11  ;;  %511 = vmatpush.msra.mxu1 %v510_v38  ;;  %v534_v60 = vand.u32 4294901760, %v533_v47  ;;  %v545_v61 = vsub.f32 %v2607_v35, %v544_v48  ;;  %v2673_v63 = vand.u32 4294901760, %v325_v55  ;;  %v556_v0 = vand.u32 4294901760, %v2646_v52 }
  0x33   : > { %675 = vmatpush.msra.mxu2 %v2570_v20  ;;  %801 = vmatpush.msra.mxu3 %v2542_v11  ;;  %v2677_v1 = vsub.f32 %v327_v43, %v2643_v51  ;;  %v2679_v2 = vand.u32 4294901760, %v307_v56  ;;  %v540_v6 = vand.u32 4294901760, %v539_v53  ;;  %v551_v7 = vsub.f32 %v2622_v42, %v550_v54  ;;  %v313_v20 = vld [vmem:[%s2508_s25 + $0x30] sm:$0xff] }
  0x34   : > { %352 = vmatpush.msra.mxu0 %v2561_v17  ;;  %517 = vmatpush.msra.mxu1 %v516_v44  ;;  %v2690_v12 = vand.u32 4294901760, %v324_v62  ;;  %v562_v13 = vand.u32 4294901760, %v2662_v59  ;;  %v2694_v18 = vsub.f32 %v326_v49, %v2659_v58  ;;  %v546_v31 = vand.u32 4294901760, %v545_v61 }
  0x35   : > { %678 = vmatpush.msra.mxu2 %v2575_v22  ;;  %803 = vmatpush.msra.mxu3 %v2561_v17  ;;  %v2697_v29 = vsub.f32 %v307_v56, %v2679_v2  ;;  %v557_v32 = vsub.f32 %v2646_v52, %v556_v0  ;;  %v2706_v36 = vand.u32 4294901760, %v323_v8  ;;  %v568_v37 = vand.u32 4294901760, %v2677_v1 }
  0x36   : > { %354 = vmatpush.msra.mxu0 %v2572_v21  ;;  %523 = vmatpush.msra.mxu1 %v522_v50  ;;  %v2710_v38 = vsub.f32 %v325_v55, %v2673_v63  ;;  %v2715_v43 = vand.u32 4294901760, %v308_v30  ;;  %v552_v44 = vand.u32 4294901760, %v551_v7  ;;  %v563_v45 = vsub.f32 %v2662_v59, %v562_v13  ;;  %v309_v7 = vld [vmem:[%s2508_s25 + $0x10] sm:$0xff] }
  0x37   : > { %681 = vmatpush.msra.mxu2 %v2587_v28  ;;  %805 = vmatpush.msra.mxu3 %v2572_v21  ;;  %v373_v39 = vand.u32 4294901760, %v2697_v29  ;;  %v3552_v47 = vand.u32 4294901760, %v2694_v18  ;;  %v2723_v49 = vsub.f32 %v324_v62, %v2690_v12  ;;  %v558_v50 = vand.u32 4294901760, %v557_v32 }
  0x38   : > { %356 = vmatpush.msra.mxu0 %v2584_v27  ;;  %529 = vmatpush.msra.mxu1 %v528_v57  ;;  %v569_v53 = vsub.f32 %v2677_v1, %v568_v37  ;;  %v3550_v55 = vand.u32 4294901760, %v2710_v38  ;;  %v2733_v56 = vsub.f32 %v323_v8, %v2706_v36  ;;  %v564_v61 = vand.u32 4294901760, %v563_v45 }
  0x39   : > { %684 = vmatpush.msra.mxu2 %v2607_v35  ;;  %807 = vmatpush.msra.mxu3 %v2584_v27  ;;  %v374_v57 = vsub.f32 %v2697_v29, %v373_v39  ;;  %v575_v62 = vsub.f32 %v2694_v18, %v3552_v47  ;;  %v2754_v45 = vand.u32 4294901760, %v309_v7  ;;  %v310_v47 = vld [vmem:[%s2508_s25 + $0x18] sm:$0xff]  ;;  %v2816_v22 = vand.u32 4294901760, %v313_v20 }
  0x3a   : > { %358 = vmatpush.msra.mxu0 %v2617_v40  ;;  %535 = vmatpush.msra.mxu1 %v534_v60  ;;  %v380_v60 = vsub.f32 %v308_v30, %v2715_v43  ;;  %v570_v8 = vand.u32 4294901760, %v569_v53  ;;  %v581_v30 = vsub.f32 %v2710_v38, %v3550_v55  ;;  %v3572_v28 = vand.u32 4294901760, %v2694_v18 }
  0x3b   : > { %687 = vmatpush.msra.mxu2 %v2622_v42  ;;  %809 = vmatpush.msra.mxu3 %v2617_v40  ;;  %v375_v32 = vand.u32 4294901760, %v374_v57 }
  0x3c   : > { %360 = vmatpush.msra.mxu0 %v2631_v46  ;;  %541 = vmatpush.msra.mxu1 %v540_v6  ;;  %v3551_v6 = vand.u32 4294901760, %v2723_v49  ;;  %v582_v57 = vand.u32 4294901760, %v581_v30 }
  0x3d   : > { %690 = vmatpush.msra.mxu2 %v2646_v52  ;;  %811 = vmatpush.msra.mxu3 %v2631_v46 }
  0x3e   : > { %362 = vmatpush.msra.mxu0 %v2643_v51  ;;  %547 = vmatpush.msra.mxu1 %v546_v31  ;;  %v3553_v31 = vand.u32 4294901760, %v2733_v56  ;;  %v587_v53 = vsub.f32 %v2723_v49, %v3551_v6 }
  0x3f   : > { %693 = vmatpush.msra.mxu2 %v2662_v59  ;;  %813 = vmatpush.msra.mxu3 %v2643_v51 }
  0x40   : > { %364 = vmatpush.msra.mxu0 %v2659_v58  ;;  %553 = vmatpush.msra.mxu1 %v552_v44  ;;  %v381_v44 = vand.u32 4294901760, %v380_v60  ;;  %v593_v55 = vsub.f32 %v2733_v56, %v3553_v31  ;;  %v588_v6 = vand.u32 4294901760, %v587_v53  ;;  %v2774_v31 = vand.u32 4294901760, %v310_v47 }
  0x41   : > { %696 = vmatpush.msra.mxu2 %v2677_v1  ;;  %815 = vmatpush.msra.mxu3 %v2659_v58 }
  0x42   : > { %366 = vmatpush.msra.mxu0 %v2673_v63  ;;  %559 = vmatpush.msra.mxu1 %v558_v50  ;;  %v576_v50 = vand.u32 4294901760, %v575_v62  ;;  %v388_v62 = vsub.f32 %v309_v7, %v2754_v45  ;;  %v396_v7 = vsub.f32 %v310_v47, %v2774_v31 }
  0x43   : > { %699 = vmatpush.msra.mxu2 %v2694_v18  ;;  %817 = vmatpush.msra.mxu3 %v2673_v63 }
  0x44   : > { %368 = vmatpush.msra.mxu0 %v2690_v12  ;;  %565 = vmatpush.msra.mxu1 %v564_v61  ;;  %v382_v61 = vsub.f32 %v380_v60, %v381_v44 }
  0x45   : > { %702 = vmatpush.msra.mxu2 %v2710_v38  ;;  %819 = vmatpush.msra.mxu3 %v2690_v12 }
  0x46   : > { %370 = vmatpush.msra.mxu0 %v2706_v36  ;;  %571 = vmatpush.msra.mxu1 %v570_v8  ;;  %v594_v8 = vand.u32 4294901760, %v593_v55  ;;  %v383_v30 = vand.u32 4294901760, %v382_v61 }
  0x47   : > { %376 = vmatmul.f32.vlgmr.msra.gmra.mxu0 %v375_v32  ;;  %705 = vmatpush.msra.mxu2 %v2723_v49  ;;  %v389_v32 = vand.u32 4294901760, %v388_v62 }
  0x48   : > { %577 = vmatpush.msra.mxu1 %v576_v50  ;;  %821 = vmatpush.msra.mxu3 %v2706_v36 }
  0x49   : > { %708 = vmatpush.msra.mxu2 %v2733_v56  ;;  %825 = vmatmul.f32.vlgmr.msra.gmra.mxu3 %v373_v39  ;;  %v390_v39 = vsub.f32 %v388_v62, %v389_v32 }
  0x4a   : > { %583 = vmatpush.msra.mxu1 %v582_v57  ;;  %711 = vmatmul.f32.vlgmr.msra.gmra.mxu2 %v2697_v29  ;;  %v319_v57 = vld [vmem:[%s2508_s25 + $0x60] sm:$0xff] }
  0x4b   : > { %922 = vmatpush.msrb.mxu0 %v502_v23  ;;  %v391_v15 = vand.u32 4294901760, %v390_v39  ;;  %v397_v23 = vand.u32 4294901760, %v396_v7  ;;  %v320_v39 = vld [vmem:[%s2508_s25 + $0x68] sm:$0xff] }
  0x4c   : > { %589 = vmatpush.msra.mxu1 %v588_v6 }
  0x4d   : > { %926 = vmatpush.msrb.mxu0 %v508_v24  ;;  %v2787_v24 = vand.u32 4294901760, %v311_v14 }
  0x4e   : > { %595 = vmatpush.msra.mxu1 %v594_v8  ;;  %v2865_v8 = vand.u32 4294901760, %v319_v57 }
  0x4f   : > { %384 = vmatmul.f32.gmra.mxu0 %v383_v30  ;;  %597 = vmatmul.f32.vlgmr.msra.gmra.mxu1 %v2679_v2 }
  0x50   : > { %1049 = vmatpush.msrb.mxu1 %v2523_v3  ;;  %930 = vmatpush.msrb.mxu0 %v514_v25  ;;  %v398_v3 = vsub.f32 %v396_v7, %v397_v23 }
  0x51   : > { %831 = vmatmul.f32.gmra.mxu3 %v381_v44 }
  0x52   : > { %716 = vmatmul.f32.gmra.mxu2 %v380_v60  ;;  %1051 = vmatpush.msrb.mxu1 %v2525_v4  ;;  %v404_v4 = vsub.f32 %v311_v14, %v2787_v24 }
  0x53   : > { %934 = vmatpush.msrb.mxu0 %v520_v26  ;;  %v420_v26 = vsub.f32 %v313_v20, %v2816_v22  ;;  %v322_v20 = vld [vmem:[%s2508_s25 + $0x78] sm:$0xff] }
  0x54   : > { %1053 = vmatpush.msrb.mxu1 %v2527_v5  ;;  %v399_v5 = vand.u32 4294901760, %v398_v3  ;;  %v405_v19 = vand.u32 4294901760, %v404_v4 }
  0x55   : > { %938 = vmatpush.msrb.mxu0 %v526_v33 }
  0x56   : > { %1055 = vmatpush.msrb.mxu1 %v2538_v9  ;;  %v2800_v9 = vand.u32 4294901760, %v312_v16 }
  0x57   : > { %392 = vmatmul.f32.gmra.mxu0 %v391_v15  ;;  %601 = vmatmul.f32.gmra.mxu1 %v2715_v43  ;;  %v2870_v15 = vand.u32 4294901760, %v320_v39 }
  0x58   : > { %1057 = vmatpush.msrb.mxu1 %v2540_v10  ;;  %942 = vmatpush.msrb.mxu0 %v532_v34  ;;  %v406_v10 = vsub.f32 %v404_v4, %v405_v19  ;;  %v421_v34 = vand.u32 4294901760, %v420_v26 }
  0x59   : > { %837 = vmatmul.f32.gmra.mxu3 %v389_v32  ;;  %v468_v32 = vsub.f32 %v319_v57, %v2865_v8  ;;  %v476_v3 = vsub.f32 %v320_v39, %v2870_v15 }
  0x5a   : > { %721 = vmatmul.f32.gmra.mxu2 %v388_v62  ;;  %1059 = vmatpush.msrb.mxu1 %v2542_v11  ;;  %v412_v11 = vsub.f32 %v312_v16, %v2800_v9  ;;  %v422_v42 = vsub.f32 %v420_v26, %v421_v34 }
  0x5b   : > { %946 = vmatpush.msrb.mxu0 %v538_v41  ;;  %v3574_v41 = vand.u32 4294901760, %v2723_v49  ;;  %v469_v14 = vand.u32 4294901760, %v468_v32 }
  0x5c   : > { %1061 = vmatpush.msrb.mxu1 %v2561_v17  ;;  %v407_v17 = vand.u32 4294901760, %v406_v10  ;;  %v423_v52 = vand.u32 4294901760, %v422_v42 }
  0x5d   : > { %950 = vmatpush.msrb.mxu0 %v544_v48  ;;  %v315_v48 = vld [vmem:[%s2508_s25 + $0x40] sm:$0xff] }
  0x5e   : > { %1063 = vmatpush.msrb.mxu1 %v2572_v21  ;;  %v413_v21 = vand.u32 4294901760, %v412_v11 }
  0x5f   : > { %400 = vmatmul.f32.gmra.mxu0 %v399_v5  ;;  %605 = vmatmul.f32.gmra.mxu1 %v2754_v45  ;;  %v477_v5 = vand.u32 4294901760, %v476_v3 }
  0x60   : > { %954 = vmatpush.msrb.mxu0 %v550_v54  ;;  %1065 = vmatpush.msrb.mxu1 %v2584_v27  ;;  %v414_v25 = vsub.f32 %v412_v11, %v413_v21  ;;  %v314_v27 = vld [vmem:[%s2508_s25 + $0x38] sm:$0xff] }
  0x61   : > { %843 = vmatmul.f32.gmra.mxu3 %v397_v23  ;;  %v2831_v35 = vand.u32 4294901760, %v314_v27  ;;  %v470_v23 = vsub.f32 %v468_v32, %v469_v14  ;;  %v478_v10 = vsub.f32 %v476_v3, %v477_v5 }
  0x62   : > { %726 = vmatmul.f32.gmra.mxu2 %v396_v7  ;;  %958 = vmatpush.msrb.mxu0 %v556_v0  ;;  %v415_v33 = vand.u32 4294901760, %v414_v25  ;;  %v316_v0 = vld [vmem:[%s2508_s25 + $0x48] sm:$0xff]  ;;  %v2880_v25 = vand.u32 4294901760, %v322_v20 }
  0x63   : > { %1067 = vmatpush.msrb.mxu1 %v2617_v40  ;;  %v3573_v40 = vand.u32 4294901760, %v2710_v38  ;;  %v471_v16 = vand.u32 4294901760, %v470_v23 }
  0x64   : > { %962 = vmatpush.msrb.mxu0 %v562_v13  ;;  %v2850_v13 = vand.u32 4294901760, %v316_v0 }
  0x65   : > { %1069 = vmatpush.msrb.mxu1 %v2631_v46  ;;  %v428_v46 = vsub.f32 %v314_v27, %v2831_v35  ;;  %v492_v27 = vsub.f32 %v322_v20, %v2880_v25 }
  0x66   : > { %966 = vmatpush.msrb.mxu0 %v568_v37  ;;  %v444_v29 = vsub.f32 %v316_v0, %v2850_v13 }
  0x67   : > { %408 = vmatmul.f32.gmra.mxu0 %v407_v17  ;;  %609 = vmatmul.f32.gmra.mxu1 %v2774_v31  ;;  %v429_v54 = vand.u32 4294901760, %v428_v46  ;;  %v479_v17 = vand.u32 4294901760, %v478_v10 }
  0x68   : > { %1071 = vmatpush.msrb.mxu1 %v2643_v51  ;;  %970 = vmatpush.msrb.mxu0 %v3572_v28  ;;  %v3575_v51 = vand.u32 4294901760, %v2733_v56  ;;  %v445_v38 = vand.u32 4294901760, %v444_v29  ;;  %v318_v56 = vld [vmem:[%s2508_s25 + $0x58] sm:$0xff] }
  0x69   : > { %849 = vmatmul.f32.gmra.mxu3 %v405_v19  ;;  %v430_v59 = vsub.f32 %v428_v46, %v429_v54  ;;  %v2860_v44 = vand.u32 4294901760, %v318_v56 }
  0x6a   : > { %731 = vmatmul.f32.gmra.mxu2 %v404_v4  ;;  %1073 = vmatpush.msrb.mxu1 %v2659_v58  ;;  %v2845_v58 = vand.u32 4294901760, %v315_v48  ;;  %v446_v49 = vsub.f32 %v444_v29, %v445_v38  ;;  %v321_v4 = vld [vmem:[%s2508_s25 + $0x70] sm:$0xff] }
  0x6b   : > { %974 = vmatpush.msrb.mxu0 %v3573_v40  ;;  %v431_v1 = vand.u32 4294901760, %v430_v59  ;;  %v460_v53 = vsub.f32 %v318_v56, %v2860_v44  ;;  %v2875_v19 = vand.u32 4294901760, %v321_v4  ;;  %v1227_v40 = vld [vmem:[%s3547_s2 + $0x78] sm:$0xff] }
  0x6c   : > { %1075 = vmatpush.msrb.mxu1 %v2673_v63  ;;  %v436_v63 = vsub.f32 %v315_v48, %v2845_v58  ;;  %v447_v60 = vand.u32 4294901760, %v446_v49 }
  0x6d   : > { %978 = vmatpush.msrb.mxu0 %v3574_v41  ;;  %v461_v62 = vand.u32 4294901760, %v460_v53  ;;  %v2888_v41 = vand.u32 4294901760, %v1227_v40 }
  0x6e   : > { %1077 = vmatpush.msrb.mxu1 %v2690_v12  ;;  %v437_v12 = vand.u32 4294901760, %v436_v63 }
  0x6f   : > { %416 = vmatmul.f32.gmra.mxu0 %v415_v33  ;;  %613 = vmatmul.f32.gmra.mxu1 %v2787_v24  ;;  %v462_v30 = vsub.f32 %v460_v53, %v461_v62  ;;  %v493_v33 = vand.u32 4294901760, %v492_v27 }
  0x70   : > { %982 = vmatpush.msrb.mxu0 %v3575_v51  ;;  %1079 = vmatpush.msrb.mxu1 %v2706_v36  ;;  %v438_v18 = vsub.f32 %v436_v63, %v437_v12  ;;  %v317_v36 = vld [vmem:[%s2508_s25 + $0x50] sm:$0xff]  ;;  %s2331_s25 = scalar_lea.hbm %s2330_s11, 128 }
  0x71   : > { %855 = vmatmul.f32.gmra.mxu3 %v413_v21  ;;  %v2855_v47 = vand.u32 4294901760, %v317_v36  ;;  %v463_v7 = vand.u32 4294901760, %v462_v30  ;;  %1229 = vmatpush.msrb.mxu2 %v2888_v41  ;;  %v1223_v30 = vld [vmem:[%s3547_s2 + $0x58] sm:$0xff]  ;;  %p2332_p5 = scmp.ne.s32.totalorder %s2330_s11, %s2331_s25  ;;  %p2337_p10 = scmp.lt.s32.totalorder %s2335_s12, %s2331_s25 }
  0x72   : > { %736 = vmatmul.f32.gmra.mxu2 %v412_v11  ;;  %v439_v37 = vand.u32 4294901760, %v438_v18  ;;  %v484_v11 = vsub.f32 %v321_v4, %v2875_v19  ;;  %1680 = vmatpush.msra.mxu1 %v2888_v41  ;;  %v1225_v18 = vld [vmem:[%s3547_s2 + $0x68] sm:$0xff]  ;;  %v2965_v39 = vand.u32 4294901760, %v1223_v30  ;;  %v1222_v4 = vld [vmem:[%s3547_s2 + $0x50] sm:$0xff] }
  0x73   : > { %v452_v55 = vsub.f32 %v317_v36, %v2855_v47  ;;  %v2923_v36 = vand.u32 4294901760, %v1225_v18  ;;  %p2333_p6 = pnand %p2332_p5, %p2479_p9  ;;  %p2338_p13 = por %p2337_p10, %p2336_p8 }
  0x74   : > { %v485_v21 = vand.u32 4294901760, %v484_v11 }
  0x75   : > { %v453_v6 = vand.u32 4294901760, %v452_v55  ;;  %v2931_v49 = vsub.f32 %v1225_v18, %v2923_v36  ;;  %p2334_p7 = pneg %p2333_p6 }
  0x77   : > { %424 = vmatmul.f32.gmra.mxu0 %v423_v52  ;;  %617 = vmatmul.f32.gmra.mxu1 %v2800_v9  ;;  %v454_v50 = vsub.f32 %v452_v55, %v453_v6  ;;  %v1226_v52 = vld [vmem:[%s3547_s2 + $0x70] sm:$0xff]  ;;  %p2339_p0 = pnand %p2338_p13, %p2334_p7 }
  0x78   : > { %v2904_v59 = vand.u32 4294901760, %v1226_v52 }
  0x79   : > { %861 = vmatmul.f32.gmra.mxu3 %v421_v34  ;;  %v455_v61 = vand.u32 4294901760, %v454_v50  ;;  %v494_v34 = vsub.f32 %v492_v27, %v493_v33 }
  0x7a   : > { %741 = vmatmul.f32.gmra.mxu2 %v420_v26  ;;  %v486_v26 = vsub.f32 %v484_v11, %v485_v21  ;;  %v2910_v0 = vsub.f32 %v1226_v52, %v2904_v59  ;;  %1682 = vmatpush.msra.mxu1 %v2904_v59 }
  0x7b   : > { %v495_v42 = vand.u32 4294901760, %v494_v34  ;;  %1231 = vmatpush.msrb.mxu2 %v2904_v59 }
  0x7c   : > { %v487_v28 = vand.u32 4294901760, %v486_v26  ;;  %1684 = vmatpush.msra.mxu1 %v2923_v36 }
  0x7d   : > { %1233 = vmatpush.msrb.mxu2 %v2923_v36 }
  0x7f   : > { %432 = vmatmul.f32.gmra.mxu0 %v431_v1  ;;  %621 = vmatmul.f32.gmra.mxu1 %v2816_v22  ;;  %v3564_v1 = vand.u32 4294901760, %v2910_v0 }
  0x81   : > { %867 = vmatmul.f32.gmra.mxu3 %v429_v54 }
  0x82   : > { %746 = vmatmul.f32.gmra.mxu2 %v428_v46  ;;  %v2892_v46 = vsub.f32 %v1227_v40, %v2888_v41 }
  0x84   : > { %v3566_v48 = vand.u32 4294901760, %v2892_v46  ;;  %1552 = vmatpush.msra.mxu0 %v2892_v46 }
  0x86   : > { %v1392_v51 = vsub.f32 %v2892_v46, %v3566_v48  ;;  %1555 = vmatpush.msra.mxu0 %v2910_v0 }
  0x87   : > { %440 = vmatmul.f32.gmra.mxu0 %v439_v37  ;;  %625 = vmatmul.f32.gmra.mxu1 %v2831_v35 }
  0x88   : > { %v1393_v54 = vand.u32 4294901760, %v1392_v51  ;;  %1558 = vmatpush.msra.mxu0 %v2931_v49 }
  0x89   : > { %873 = vmatmul.f32.gmra.mxu3 %v437_v12  ;;  %v1398_v12 = vsub.f32 %v2910_v0, %v3564_v1 }
  0x8a   : > { %751 = vmatmul.f32.gmra.mxu2 %v436_v63  ;;  %1394 = vmatpush.msrb.mxu3 %v1393_v54 }
  0x8f   : > { %448 = vmatmul.f32.gmra.mxu0 %v447_v60  ;;  %629 = vmatmul.f32.gmra.mxu1 %v2845_v58  ;;  %v1224_v60 = vld [vmem:[%s3547_s2 + $0x60] sm:$0xff] }
  0x90   : > { %v2944_v50 = vand.u32 4294901760, %v1224_v60 }
  0x91   : > { %879 = vmatmul.f32.gmra.mxu3 %v445_v38 }
  0x92   : > { %756 = vmatmul.f32.gmra.mxu2 %v444_v29  ;;  %v1399_v29 = vand.u32 4294901760, %v1398_v12  ;;  %1686 = vmatpush.msra.mxu1 %v2944_v50 }
  0x93   : > { %1235 = vmatpush.msrb.mxu2 %v2944_v50 }
  0x94   : > { %1400 = vmatpush.msrb.mxu3 %v1399_v29  ;;  %1688 = vmatpush.msra.mxu1 %v2965_v39 }
  0x95   : > { %1237 = vmatpush.msrb.mxu2 %v2965_v39 }
  0x97   : > { %456 = vmatmul.f32.gmra.mxu0 %v455_v61  ;;  %633 = vmatmul.f32.gmra.mxu1 %v2850_v13 }
  0x99   : > { %885 = vmatmul.f32.gmra.mxu3 %v453_v6 }
  0x9a   : > { %761 = vmatmul.f32.gmra.mxu2 %v452_v55  ;;  %v3563_v55 = vand.u32 4294901760, %v2931_v49 }
  0x9c   : > { %v1404_v56 = vsub.f32 %v2931_v49, %v3563_v55  ;;  %v1213_v55 = vld [vmem:[%s3547_s2 + $0x8] sm:$0xff] }
  0x9d   : > { %v3169_v48 = vand.u32 4294901760, %v1213_v55 }
  0x9e   : > { %v1405_v6 = vand.u32 4294901760, %v1404_v56  ;;  %v1219_v56 = vld [vmem:[%s3547_s2 + $0x38] sm:$0xff] }
  0x9f   : > { %464 = vmatmul.f32.gmra.mxu0 %v463_v7  ;;  %637 = vmatmul.f32.gmra.mxu1 %v2855_v47 }
  0xa0   : > { %1406 = vmatpush.msrb.mxu3 %v1405_v6  ;;  %v3049_v6 = vand.u32 4294901760, %v1219_v56 }
  0xa1   : > { %891 = vmatmul.f32.gmra.mxu3 %v461_v62 }
  0xa2   : > { %766 = vmatmul.f32.gmra.mxu2 %v460_v53 }
  0xa7   : > { %472 = vmatmul.f32.gmra.mxu0 %v471_v16  ;;  %641 = vmatmul.f32.gmra.mxu1 %v2860_v44 }
  0xa9   : > { %897 = vmatmul.f32.gmra.mxu3 %v469_v14 }
  0xaa   : > { %771 = vmatmul.f32.gmra.mxu2 %v468_v32 }
  0xaf   : > { %480 = vmatmul.f32.gmra.mxu0 %v479_v17  ;;  %645 = vmatmul.f32.gmra.mxu1 %v2865_v8 }
  0xb1   : > { %903 = vmatmul.f32.gmra.mxu3 %v477_v5  ;;  %v2986_v5 = vand.u32 4294901760, %v1222_v4 }
  0xb2   : > { %776 = vmatmul.f32.gmra.mxu2 %v476_v3 }
  0xb3   : > { %1239 = vmatpush.msrb.mxu2 %v2986_v5  ;;  %1690 = vmatpush.msra.mxu1 %v2986_v5 }
  0xb7   : > { %488 = vmatmul.f32.gmra.mxu0 %v487_v28  ;;  %649 = vmatmul.f32.gmra.mxu1 %v2870_v15 }
  0xb9   : > { %909 = vmatmul.f32.gmra.mxu3 %v485_v21  ;;  %v1221_v21 = vld [vmem:[%s3547_s2 + $0x48] sm:$0xff] }
  0xba   : > { %781 = vmatmul.f32.gmra.mxu2 %v484_v11 }
  0xbf   : > { %496 = vmatmul.f32.gmra.mxu0 %v495_v42  ;;  %653 = vmatmul.f32.gmra.mxu1 %v2875_v19  ;;  %v1220_v42 = vld [vmem:[%s3547_s2 + $0x40] sm:$0xff] }
  0xc0   : > { %v3028_v52 = vand.u32 4294901760, %v1220_v42 }
  0xc1   : > { %915 = vmatmul.f32.gmra.mxu3 %v493_v33 }
  0xc2   : > { %786 = vmatmul.f32.gmra.mxu2 %v492_v27  ;;  %v3007_v27 = vand.u32 4294901760, %v1221_v21 }
  0xc4   : > { %v2906_v63 = vpop.f32.mrf.mxu0  ;;  %1241 = vmatpush.msrb.mxu2 %v3007_v27  ;;  %1692 = vmatpush.msra.mxu1 %v3007_v27 }
  0xc6   : > { %1243 = vmatpush.msrb.mxu2 %v3028_v52  ;;  %1694 = vmatpush.msra.mxu1 %v3028_v52 }
  0xc7   : > { %657 = vmatmul.f32.gmra.mxu1 %v2880_v25  ;;  %984 = vmatmul.f32.vlgmr.msrb.gmra.mxu0 %v2679_v2 }
  0xc8   : > { %1245 = vmatpush.msrb.mxu2 %v3049_v6  ;;  %1696 = vmatpush.msra.mxu1 %v3049_v6 }
  0xcc   : > { %v2925_v37 = vpop.f32.mrf.mxu0  ;;  %v2927_v38 = vpop.f32.mrf.mxu1 }
  0xcf   : > { %988 = vmatmul.f32.gmra.mxu0 %v2715_v43  ;;  %1081 = vmatmul.f32.vlgmr.msrb.gmra.mxu1 %v2679_v2  ;;  %v2952_v2 = vsub.f32 %v1224_v60, %v2944_v50 }
  0xd1   : > { %v3562_v61 = vand.u32 4294901760, %v2952_v2  ;;  %1561 = vmatpush.msra.mxu0 %v2952_v2 }
  0xd3   : > { %v1410_v62 = vsub.f32 %v2952_v2, %v3562_v61  ;;  %v3156_v61 = vpop.f32.mrf.mxu2 }
  0xd4   : > { %v2946_v53 = vpop.f32.mrf.mxu0  ;;  %v2948_v57 = vpop.f32.mrf.mxu1 }
  0xd5   : > { %v1411_v32 = vand.u32 4294901760, %v1410_v62 }
  0xd7   : > { %992 = vmatmul.f32.gmra.mxu0 %v2754_v45  ;;  %1085 = vmatmul.f32.gmra.mxu1 %v2715_v43  ;;  %v2973_v43 = vsub.f32 %v1223_v30, %v2965_v39 }
  0xd8   : > { %1412 = vmatpush.msrb.mxu3 %v1411_v32 }
  0xd9   : > { %v3561_v23 = vand.u32 4294901760, %v2973_v43  ;;  %1564 = vmatpush.msra.mxu0 %v2973_v43 }
  0xdb   : > { %v1416_v3 = vsub.f32 %v2973_v43, %v3561_v23 }
  0xdc   : > { %v2967_v7 = vpop.f32.mrf.mxu0  ;;  %v2969_v14 = vpop.f32.mrf.mxu1 }
  0xdd   : > { %v1417_v16 = vand.u32 4294901760, %v1416_v3 }
  0xdf   : > { %996 = vmatmul.f32.gmra.mxu0 %v2774_v31  ;;  %1089 = vmatmul.f32.gmra.mxu1 %v2754_v45  ;;  %v2994_v45 = vsub.f32 %v1222_v4, %v2986_v5  ;;  %v1218_v4 = vld [vmem:[%s3547_s2 + $0x30] sm:$0xff] }
  0xe0   : > { %1418 = vmatpush.msrb.mxu3 %v1417_v16 }
  0xe1   : > { %v3559_v20 = vand.u32 4294901760, %v2994_v45  ;;  %1567 = vmatpush.msra.mxu0 %v2994_v45 }
  0xe3   : > { %v1422_v17 = vsub.f32 %v2994_v45, %v3559_v20 }
  0xe4   : > { %v2988_v10 = vpop.f32.mrf.mxu0  ;;  %v2990_v11 = vpop.f32.mrf.mxu1 }
  0xe5   : > { %v1423_v26 = vand.u32 4294901760, %v1422_v17  ;;  %v3070_v17 = vand.u32 4294901760, %v1218_v4 }
  0xe7   : > { %1000 = vmatmul.f32.gmra.mxu0 %v2787_v24  ;;  %1093 = vmatmul.f32.gmra.mxu1 %v2774_v31  ;;  %v3015_v31 = vsub.f32 %v1221_v21, %v3007_v27 }
  0xe8   : > { %1424 = vmatpush.msrb.mxu3 %v1423_v26  ;;  %1247 = vmatpush.msrb.mxu2 %v3070_v17 }
  0xe9   : > { %v3558_v34 = vand.u32 4294901760, %v3015_v31  ;;  %1570 = vmatpush.msra.mxu0 %v3015_v31  ;;  %1698 = vmatpush.msra.mxu1 %v3070_v17 }
  0xeb   : > { %v1428_v40 = vsub.f32 %v3015_v31, %v3558_v34 }
  0xec   : > { %v3009_v28 = vpop.f32.mrf.mxu0  ;;  %v3011_v33 = vpop.f32.mrf.mxu1 }
  0xed   : > { %v1429_v51 = vand.u32 4294901760, %v1428_v40 }
  0xef   : > { %1004 = vmatmul.f32.gmra.mxu0 %v2800_v9  ;;  %1097 = vmatmul.f32.gmra.mxu1 %v2787_v24  ;;  %v3036_v24 = vsub.f32 %v1220_v42, %v3028_v52 }
  0xf0   : > { %1430 = vmatpush.msrb.mxu3 %v1429_v51  ;;  %v1217_v51 = vld [vmem:[%s3547_s2 + $0x28] sm:$0xff] }
  0xf1   : > { %v3557_v18 = vand.u32 4294901760, %v3036_v24  ;;  %1573 = vmatpush.msra.mxu0 %v3036_v24 }
  0xf3   : > { %v1434_v29 = vsub.f32 %v3036_v24, %v3557_v18 }
  0xf4   : > { %v3030_v54 = vpop.f32.mrf.mxu0  ;;  %v3032_v12 = vpop.f32.mrf.mxu1 }
  0xf5   : > { %v1435_v60 = vand.u32 4294901760, %v1434_v29 }
  0xf7   : > { %1008 = vmatmul.f32.gmra.mxu0 %v2816_v22  ;;  %1101 = vmatmul.f32.gmra.mxu1 %v2800_v9  ;;  %v3057_v9 = vsub.f32 %v1219_v56, %v3049_v6  ;;  %v3091_v56 = vand.u32 4294901760, %v1217_v51 }
  0xf8   : > { %1436 = vmatpush.msrb.mxu3 %v1435_v60 }
  0xf9   : > { %v3555_v32 = vand.u32 4294901760, %v3057_v9  ;;  %1576 = vmatpush.msra.mxu0 %v3057_v9  ;;  %1249 = vmatpush.msrb.mxu2 %v3091_v56 }
  0xfa   : > { %1700 = vmatpush.msra.mxu1 %v3091_v56 }
  0xfb   : > { %v1440_v3 = vsub.f32 %v3057_v9, %v3555_v32 }
  0xfc   : > { %v3051_v62 = vpop.f32.mrf.mxu0  ;;  %v3053_v30 = vpop.f32.mrf.mxu1 }
  0xfd   : > { %v1441_v16 = vand.u32 4294901760, %v1440_v3 }
  0xff   : > { %1012 = vmatmul.f32.gmra.mxu0 %v2831_v35  ;;  %1105 = vmatmul.f32.gmra.mxu1 %v2816_v22  ;;  %v3078_v22 = vsub.f32 %v1218_v4, %v3070_v17 }
 0x100   : > { %1442 = vmatpush.msrb.mxu3 %v1441_v16 }
 0x101   : > { %v3554_v40 = vand.u32 4294901760, %v3078_v22  ;;  %1579 = vmatpush.msra.mxu0 %v3078_v22 }
 0x103   : > { %v1446_v42 = vsub.f32 %v3078_v22, %v3554_v40 }
 0x104   : > { %v3072_v21 = vpop.f32.mrf.mxu0  ;;  %v3074_v26 = vpop.f32.mrf.mxu1 }
 0x105   : > { %3576 = vst [vmem:[#allocation9_spill] sm:$0xff] %v3072_v21  ;;  %v1447_v29 = vand.u32 4294901760, %v1446_v42  ;;  %v1216_v42 = vld [vmem:[%s3547_s2 + $0x20] sm:$0xff] }
 0x107   : > { %1016 = vmatmul.f32.gmra.mxu0 %v2845_v58  ;;  %1109 = vmatmul.f32.gmra.mxu1 %v2831_v35  ;;  %v3099_v35 = vsub.f32 %v1217_v51, %v3091_v56 }
 0x108   : > { %1448 = vmatpush.msrb.mxu3 %v1447_v29  ;;  %v3112_v29 = vand.u32 4294901760, %v1216_v42 }
 0x109   : > { %v3556_v4 = vand.u32 4294901760, %v3099_v35  ;;  %1582 = vmatpush.msra.mxu0 %v3099_v35 }
 0x10a   : > { %1251 = vmatpush.msrb.mxu2 %v3112_v29  ;;  %1702 = vmatpush.msra.mxu1 %v3112_v29 }
 0x10b   : > { %v1452_v16 = vsub.f32 %v3099_v35, %v3556_v4 }
 0x10c   : > { %v3093_v60 = vpop.f32.mrf.mxu0  ;;  %v3095_v3 = vpop.f32.mrf.mxu1 }
 0x10d   : > { %3577 = vst [vmem:[#allocation10_spill] sm:$0xff] %v3093_v60  ;;  %v1453_v51 = vand.u32 4294901760, %v1452_v16 }
 0x10e   : > { %3578 = vst [vmem:[#allocation11_spill] sm:$0xff] %v3095_v3 }
 0x10f   : > { %1020 = vmatmul.f32.gmra.mxu0 %v2850_v13  ;;  %1113 = vmatmul.f32.gmra.mxu1 %v2845_v58  ;;  %v3120_v58 = vsub.f32 %v1216_v42, %v3112_v29 }
 0x110   : > { %1454 = vmatpush.msrb.mxu3 %v1453_v51  ;;  %v1215_v51 = vld [vmem:[%s3547_s2 + $0x18] sm:$0xff] }
 0x111   : > { %v3560_v4 = vand.u32 4294901760, %v3120_v58  ;;  %1585 = vmatpush.msra.mxu0 %v3120_v58  ;;  %v3133_v18 = vand.u32 4294901760, %v1215_v51 }
 0x113   : > { %v1458_v16 = vsub.f32 %v3120_v58, %v3560_v4  ;;  %1253 = vmatpush.msrb.mxu2 %v3133_v18  ;;  %1704 = vmatpush.msra.mxu1 %v3133_v18 }
 0x114   : > { %v3114_v40 = vpop.f32.mrf.mxu0  ;;  %v3116_v32 = vpop.f32.mrf.mxu1 }
 0x115   : > { %3579 = vst [vmem:[#allocation12_spill] sm:$0xff] %v3114_v40  ;;  %v1459_v42 = vand.u32 4294901760, %v1458_v16 }
 0x116   : > { %3580 = vst [vmem:[#allocation13_spill] sm:$0xff] %v3116_v32 }
 0x117   : > { %1024 = vmatmul.f32.gmra.mxu0 %v2855_v47  ;;  %1117 = vmatmul.f32.gmra.mxu1 %v2850_v13  ;;  %v3141_v13 = vsub.f32 %v1215_v51, %v3133_v18 }
 0x118   : > { %1460 = vmatpush.msrb.mxu3 %v1459_v42  ;;  %v1214_v42 = vld [vmem:[%s3547_s2 + $0x10] sm:$0xff] }
 0x119   : > { %v3565_v4 = vand.u32 4294901760, %v3141_v13  ;;  %1588 = vmatpush.msra.mxu0 %v3141_v13  ;;  %v3154_v23 = vand.u32 4294901760, %v1214_v42 }
 0x11b   : > { %v1464_v16 = vsub.f32 %v3141_v13, %v3565_v4  ;;  %1255 = vmatpush.msrb.mxu2 %v3154_v23  ;;  %v3167_v4 = vsub.f32 %v1214_v42, %v3154_v23  ;;  %1706 = vmatpush.msra.mxu1 %v3154_v23  ;;  %v3183_v42 = vpop.f32.mrf.mxu3 }
 0x11c   : > { %v3135_v34 = vpop.f32.mrf.mxu0  ;;  %v3137_v20 = vpop.f32.mrf.mxu1 }
 0x11d   : > { %3581 = vst [vmem:[#allocation14_spill] sm:$0xff] %v3135_v34  ;;  %v1465_v51 = vand.u32 4294901760, %v1464_v16  ;;  %v1212_v16 = vld [vmem:[%s3547_s2] sm:$0xff]  ;;  %v3567_v34 = vand.u32 4294901760, %v3167_v4  ;;  %1257 = vmatpush.msrb.mxu2 %v3169_v48  ;;  %1591 = vmatpush.msra.mxu0 %v3167_v4 }
 0x11e   : > { %3582 = vst [vmem:[#allocation15_spill] sm:$0xff] %v3137_v20  ;;  %1708 = vmatpush.msra.mxu1 %v3169_v48 }
 0x11f   : > { %1028 = vmatmul.f32.gmra.mxu0 %v2860_v44  ;;  %1121 = vmatmul.f32.gmra.mxu1 %v2855_v47 }
 0x120   : > { %1466 = vmatpush.msrb.mxu3 %v1465_v51  ;;  %v3181_v51 = vand.u32 4294901760, %v1212_v16 }
 0x122   : > { %v3192_v40 = vsub.f32 %v1212_v16, %v3181_v51  ;;  %1259 = vmatpush.msrb.mxu2 %v3181_v51  ;;  %1710 = vmatpush.msra.mxu1 %v3181_v51  ;;  %v3586_v16 = vand.u32 4294901760, %v2910_v0  ;;  %v3588_v0 = vand.u32 4294901760, %v2952_v2 }
 0x124   : > { %v3161_v1 = vpop.f32.mrf.mxu0  ;;  %v3163_v47 = vpop.f32.mrf.mxu1  ;;  %v1481_v60 = vand.u32 4294901760, %v3192_v40 }
 0x125   : > { %3583 = vst [vmem:[#allocation16_spill] sm:$0xff] %v3161_v1  ;;  %v3178_v1 = vsub.f32 %v1213_v55, %v3169_v48  ;;  %v3585_v55 = vand.u32 4294901760, %v2892_v46 }
 0x126   : > { %3584 = vst [vmem:[#allocation17_spill] sm:$0xff] %v3163_v47  ;;  %v1470_v47 = vsub.f32 %v3167_v4, %v3567_v34  ;;  %v1482_v46 = vsub.f32 %v3192_v40, %v1481_v60 }
 0x127   : > { %1032 = vmatmul.f32.gmra.mxu0 %v2865_v8  ;;  %1125 = vmatmul.f32.gmra.mxu1 %v2860_v44  ;;  %v1475_v20 = vand.u32 4294901760, %v3178_v1 }
 0x128   : > { %1594 = vmatpush.msra.mxu0 %v3178_v1  ;;  %1811 = vmatpush.msra.mxu2 %v3585_v55  ;;  %v1471_v32 = vand.u32 4294901760, %v1470_v47  ;;  %v717_v47 = vpop.f32.mrf.mxu2  ;;  %v1483_v55 = vand.u32 4294901760, %v1482_v46 }
 0x129   : > { %v1476_v44 = vsub.f32 %v3178_v1, %v1475_v20  ;;  %v3587_v1 = vand.u32 4294901760, %v2931_v49 }
 0x12a   : > { %1597 = vmatpush.msra.mxu0 %v3192_v40  ;;  %1815 = vmatpush.msra.mxu2 %v3586_v16  ;;  %v832_v16 = vpop.f32.mrf.mxu3  ;;  %v3590_v40 = vand.u32 4294901760, %v2994_v45 }
 0x12b   : > { %1472 = vmatpush.msrb.mxu3 %v1471_v32  ;;  %v1477_v21 = vand.u32 4294901760, %v1476_v44  ;;  %v3589_v32 = vand.u32 4294901760, %v2973_v43 }
 0x12c   : > { %v3205_v34 = vpop.f32.mrf.mxu0  ;;  %v3207_v3 = vpop.f32.mrf.mxu1  ;;  %1819 = vmatpush.msra.mxu2 %v3587_v1 }
 0x12d   : > { %1478 = vmatpush.msrb.mxu3 %v1477_v21 }
 0x12e   : > { %1823 = vmatpush.msra.mxu2 %v3588_v0 }
 0x12f   : > { %1036 = vmatmul.f32.gmra.mxu0 %v2870_v15  ;;  %1129 = vmatmul.f32.gmra.mxu1 %v2865_v8  ;;  %v3591_v8 = vand.u32 4294901760, %v3015_v31  ;;  %v3594_v31 = vand.u32 4294901760, %v3078_v22 }
 0x130   : > { %1484 = vmatpush.msrb.mxu3 %v1483_v55  ;;  %1827 = vmatpush.msra.mxu2 %v3589_v32  ;;  %v722_v2 = vpop.f32.mrf.mxu2 }
 0x132   : > { %1938 = vmatpush.msra.mxu3 %v2888_v41  ;;  %1831 = vmatpush.msra.mxu2 %v3590_v40  ;;  %v3592_v41 = vand.u32 4294901760, %v3036_v24  ;;  %v838_v43 = vpop.f32.mrf.mxu3 }
 0x134   : > { %1940 = vmatpush.msra.mxu3 %v2904_v59  ;;  %v3220_v49 = vpop.f32.mrf.mxu0  ;;  %v3222_v21 = vpop.f32.mrf.mxu1  ;;  %1835 = vmatpush.msra.mxu2 %v3591_v8  ;;  %v3593_v59 = vand.u32 4294901760, %v3057_v9 }
 0x136   : > { %1942 = vmatpush.msra.mxu3 %v2923_v36  ;;  %1839 = vmatpush.msra.mxu2 %v3592_v41 }
 0x137   : > { %1040 = vmatmul.f32.gmra.mxu0 %v2875_v19  ;;  %1133 = vmatmul.f32.gmra.mxu1 %v2870_v15  ;;  %v3595_v15 = vand.u32 4294901760, %v3099_v35 }
 0x138   : > { %1944 = vmatpush.msra.mxu3 %v2944_v50  ;;  %1843 = vmatpush.msra.mxu2 %v3593_v59  ;;  %v3596_v50 = vand.u32 4294901760, %v3120_v58 }
 0x13a   : > { %1946 = vmatpush.msra.mxu3 %v2965_v39  ;;  %1847 = vmatpush.msra.mxu2 %v3594_v31  ;;  %v599_v39 = vadd.f32 %v2927_v38, %v2906_v63  ;;  %v844_v22 = vpop.f32.mrf.mxu3  ;;  %v603_v38 = vadd.f32 %v2948_v57, %v2925_v37  ;;  %v607_v57 = vadd.f32 %v2969_v14, %v2946_v53 }
 0x13b   : > { %v611_v53 = vadd.f32 %v2990_v11, %v2967_v7 }
 0x13c   : > { %v3237_v36 = vpop.f32.mrf.mxu0  ;;  %v3239_v45 = vpop.f32.mrf.mxu1  ;;  %1948 = vmatpush.msra.mxu3 %v2986_v5  ;;  %1851 = vmatpush.msra.mxu2 %v3595_v15  ;;  %v723_v58 = vadd.f32 %v722_v2, %v607_v57 }
 0x13d   : > { %v727_v5 = vpop.f32.mrf.mxu2 }
 0x13e   : > { %1950 = vmatpush.msra.mxu3 %v3007_v27  ;;  %1855 = vmatpush.msra.mxu2 %v3596_v50  ;;  %v3597_v27 = vand.u32 4294901760, %v3141_v13  ;;  %v728_v40 = vadd.f32 %v727_v5, %v611_v53 }
 0x13f   : > { %1044 = vmatmul.f32.gmra.mxu0 %v2880_v25  ;;  %1137 = vmatmul.f32.gmra.mxu1 %v2875_v19  ;;  %v3598_v19 = vand.u32 4294901760, %v3167_v4 }
 0x140   : > { %1952 = vmatpush.msra.mxu3 %v3028_v52  ;;  %1859 = vmatpush.msra.mxu2 %v3597_v27  ;;  %v713_v52 = vadd.f32 %v3156_v61, %v599_v39  ;;  %v845_v11 = vadd.f32 %v844_v22, %v728_v40 }
 0x142   : > { %1954 = vmatpush.msra.mxu3 %v3049_v6  ;;  %1863 = vmatpush.msra.mxu2 %v3598_v19  ;;  %v827_v63 = vadd.f32 %v3183_v42, %v713_v52 }
 0x144   : > { %v3257_v24 = vpop.f32.mrf.mxu1  ;;  %v985_v9 = vpop.f32.mrf.mxu0  ;;  %1956 = vmatpush.msra.mxu3 %v3070_v17  ;;  %1867 = vmatpush.msra.mxu2 %v1475_v20  ;;  %v718_v20 = vadd.f32 %v717_v47, %v603_v38  ;;  %v839_v47 = vadd.f32 %v838_v43, %v723_v58  ;;  %v615_v43 = vadd.f32 %v3011_v33, %v2988_v10 }
 0x145   : > { %v732_v6 = vpop.f32.mrf.mxu2  ;;  %v986_v17 = vadd.f32 %v985_v9, %v827_v63  ;;  %v619_v33 = vadd.f32 %v3032_v12, %v3009_v28 }
 0x146   : > { %1958 = vmatpush.msra.mxu3 %v3091_v56  ;;  %1871 = vmatpush.msra.mxu2 %v1481_v60  ;;  %v833_v37 = vadd.f32 %v832_v16, %v718_v20  ;;  %v733_v9 = vadd.f32 %v732_v6, %v615_v43 }
 0x147   : > { %1141 = vmatmul.f32.gmra.mxu1 %v2880_v25  ;;  %v850_v25 = vpop.f32.mrf.mxu3 }
 0x148   : > { %1960 = vmatpush.msra.mxu3 %v3112_v29  ;;  %v851_v10 = vadd.f32 %v850_v25, %v733_v9 }
 0x14a   : > { %1962 = vmatpush.msra.mxu3 %v3133_v18 }
 0x14c   : > { %v989_v61 = vpop.f32.mrf.mxu0  ;;  %v1082_v35 = vpop.f32.mrf.mxu1  ;;  %1964 = vmatpush.msra.mxu3 %v3154_v23 }
 0x14d   : > { %v1083_v56 = vadd.f32 %v1082_v35, %v986_v17  ;;  %v737_v13 = vpop.f32.mrf.mxu2 }
 0x14e   : > { %1966 = vmatpush.msra.mxu3 %v3169_v48  ;;  %v990_v48 = vadd.f32 %v989_v61, %v833_v37 }
 0x14f   : > { %1196 = vst [vmem:[%s3274_s14] sm:$0xff] %v1083_v56  ;;  %v3277_v60 = vand.u32 4294901760, %v1083_v56  ;;  %v856_v14 = vpop.f32.mrf.mxu3 }
 0x150   : > { %1968 = vmatpush.msra.mxu3 %v3181_v51 }
 0x151   : > { %v1261_v23 = vsub.f32 %v1083_v56, %v3277_v60  ;;  %1486 = vmatmul.f32.vlgmr.msrb.gmra.mxu3 %v3277_v60  ;;  %v738_v56 = vadd.f32 %v737_v13, %v619_v33 }
 0x153   : > { %v1262_v18 = vand.u32 4294901760, %v1261_v23  ;;  %1600 = vmatmul.f32.vlgmr.msra.gmra.mxu0 %v1261_v23  ;;  %v857_v12 = vadd.f32 %v856_v14, %v738_v56 }
 0x154   : > { %v993_v4 = vpop.f32.mrf.mxu0  ;;  %v1086_v29 = vpop.f32.mrf.mxu1 }
 0x155   : > { %v1087_v42 = vadd.f32 %v1086_v29, %v990_v48  ;;  %1714 = vmatmul.f32.vlgmr.msra.gmra.mxu1 %v1262_v18  ;;  %v1263_v44 = vsub.f32 %v1261_v23, %v1262_v18  ;;  %v994_v55 = vadd.f32 %v993_v4, %v839_v47  ;;  %v742_v41 = vpop.f32.mrf.mxu2  ;;  %v623_v48 = vadd.f32 %v3053_v30, %v3030_v54 }
 0x157   : > { %1197 = vst [vmem:[%s3274_s14 + $0x8] sm:$0xff] %v1087_v42  ;;  %v3285_v51 = vand.u32 4294901760, %v1087_v42  ;;  %v1264_v46 = vand.u32 4294901760, %v1263_v44  ;;  %v862_v15 = vpop.f32.mrf.mxu3  ;;  %v743_v44 = vadd.f32 %v742_v41, %v623_v48 }
 0x159   : > { %1265 = vmatmul.f32.vlgmr.msrb.gmra.mxu2 %v1264_v46  ;;  %1490 = vmatmul.f32.gmra.mxu3 %v3285_v51  ;;  %v1269_v1 = vsub.f32 %v1087_v42, %v3285_v51  ;;  %v863_v30 = vadd.f32 %v862_v15, %v743_v44  ;;  %v3604_v44 = vld [vmem:[#allocation15_spill] sm:$0xff] }
 0x15b   : > { %1605 = vmatmul.f32.gmra.mxu0 %v1269_v1  ;;  %v1270_v0 = vand.u32 4294901760, %v1269_v1 }
 0x15c   : > { %v997_v16 = vpop.f32.mrf.mxu0  ;;  %v1090_v32 = vpop.f32.mrf.mxu1 }
 0x15d   : > { %v1091_v8 = vadd.f32 %v1090_v32, %v994_v55  ;;  %1720 = vmatmul.f32.gmra.mxu1 %v1270_v0  ;;  %v1271_v2 = vsub.f32 %v1269_v1, %v1270_v0  ;;  %v998_v50 = vadd.f32 %v997_v16, %v845_v11  ;;  %v747_v38 = vpop.f32.mrf.mxu2  ;;  %v627_v1 = vadd.f32 %v3074_v26, %v3051_v62  ;;  %v3599_v26 = vld [vmem:[#allocation9_spill] sm:$0xff] }
 0x15f   : > { %1198 = vst [vmem:[%s3274_s14 + $0x10] sm:$0xff] %v1091_v8  ;;  %v3292_v59 = vand.u32 4294901760, %v1091_v8  ;;  %v1272_v7 = vand.u32 4294901760, %v1271_v2  ;;  %v868_v37 = vpop.f32.mrf.mxu3 }
 0x161   : > { %1273 = vmatmul.f32.gmra.mxu2 %v1272_v7  ;;  %1494 = vmatmul.f32.gmra.mxu3 %v3292_v59  ;;  %v1277_v31 = vsub.f32 %v1091_v8, %v3292_v59  ;;  %v748_v8 = vadd.f32 %v747_v38, %v627_v1 }
 0x163   : > { %1610 = vmatmul.f32.gmra.mxu0 %v1277_v31  ;;  %v1278_v39 = vand.u32 4294901760, %v1277_v31  ;;  %v869_v62 = vadd.f32 %v868_v37, %v748_v8 }
 0x164   : > { %v1001_v5 = vpop.f32.mrf.mxu0  ;;  %v1094_v27 = vpop.f32.mrf.mxu1 }
 0x165   : > { %v1095_v19 = vadd.f32 %v1094_v27, %v998_v50  ;;  %1726 = vmatmul.f32.gmra.mxu1 %v1278_v39  ;;  %v1279_v52 = vsub.f32 %v1277_v31, %v1278_v39  ;;  %v1002_v61 = vadd.f32 %v1001_v5, %v851_v10  ;;  %v752_v4 = vpop.f32.mrf.mxu2  ;;  %v3600_v31 = vld [vmem:[#allocation11_spill] sm:$0xff] }
 0x166   : > { %v631_v15 = vadd.f32 %v3600_v31, %v3599_v26 }
 0x167   : > { %1199 = vst [vmem:[%s3274_s14 + $0x18] sm:$0xff] %v1095_v19  ;;  %v3299_v22 = vand.u32 4294901760, %v1095_v19  ;;  %v1280_v63 = vand.u32 4294901760, %v1279_v52  ;;  %v874_v53 = vpop.f32.mrf.mxu3 }
 0x168   : > { %v753_v52 = vadd.f32 %v752_v4, %v631_v15 }
 0x169   : > { %1281 = vmatmul.f32.gmra.mxu2 %v1280_v63  ;;  %1498 = vmatmul.f32.gmra.mxu3 %v3299_v22  ;;  %v1285_v17 = vsub.f32 %v1095_v19, %v3299_v22 }
 0x16b   : > { %1615 = vmatmul.f32.gmra.mxu0 %v1285_v17  ;;  %v1286_v6 = vand.u32 4294901760, %v1285_v17 }
 0x16c   : > { %v1005_v35 = vpop.f32.mrf.mxu0  ;;  %v1098_v20 = vpop.f32.mrf.mxu1 }
 0x16d   : > { %v1099_v57 = vadd.f32 %v1098_v20, %v1002_v61  ;;  %1732 = vmatmul.f32.gmra.mxu1 %v1286_v6  ;;  %v1287_v25 = vsub.f32 %v1285_v17, %v1286_v6  ;;  %v1006_v29 = vadd.f32 %v1005_v35, %v857_v12  ;;  %v757_v2 = vpop.f32.mrf.mxu2  ;;  %v875_v61 = vadd.f32 %v874_v53, %v753_v52  ;;  %v3601_v6 = vld [vmem:[#allocation10_spill] sm:$0xff]  ;;  %v3602_v35 = vld [vmem:[#allocation13_spill] sm:$0xff] }
 0x16e   : > { %v635_v20 = vadd.f32 %v3602_v35, %v3601_v6 }
 0x16f   : > { %1200 = vst [vmem:[%s3274_s14 + $0x20] sm:$0xff] %v1099_v57  ;;  %v3306_v23 = vand.u32 4294901760, %v1099_v57  ;;  %v1288_v28 = vand.u32 4294901760, %v1287_v25  ;;  %v880_v50 = vpop.f32.mrf.mxu3 }
 0x170   : > { %v758_v48 = vadd.f32 %v757_v2, %v635_v20 }
 0x171   : > { %1289 = vmatmul.f32.gmra.mxu2 %v1288_v28  ;;  %1502 = vmatmul.f32.gmra.mxu3 %v3306_v23  ;;  %v1293_v18 = vsub.f32 %v1099_v57, %v3306_v23 }
 0x173   : > { %1620 = vmatmul.f32.gmra.mxu0 %v1293_v18  ;;  %v1294_v58 = vand.u32 4294901760, %v1293_v18 }
 0x174   : > { %v1009_v13 = vpop.f32.mrf.mxu0  ;;  %v1102_v42 = vpop.f32.mrf.mxu1 }
 0x175   : > { %v1103_v46 = vadd.f32 %v1102_v42, %v1006_v29  ;;  %1738 = vmatmul.f32.gmra.mxu1 %v1294_v58  ;;  %v1295_v47 = vsub.f32 %v1293_v18, %v1294_v58  ;;  %v1010_v0 = vadd.f32 %v1009_v13, %v863_v30  ;;  %v762_v33 = vpop.f32.mrf.mxu2  ;;  %v881_v13 = vadd.f32 %v880_v50, %v758_v48  ;;  %v3603_v42 = vld [vmem:[#allocation12_spill] sm:$0xff] }
 0x177   : > { %1201 = vst [vmem:[%s3274_s14 + $0x28] sm:$0xff] %v1103_v46  ;;  %v3313_v14 = vand.u32 4294901760, %v1103_v46  ;;  %v1296_v54 = vand.u32 4294901760, %v1295_v47  ;;  %v886_v37 = vpop.f32.mrf.mxu3 }
 0x179   : > { %1297 = vmatmul.f32.gmra.mxu2 %v1296_v54  ;;  %1506 = vmatmul.f32.gmra.mxu3 %v3313_v14  ;;  %v1301_v55 = vsub.f32 %v1103_v46, %v3313_v14  ;;  %v639_v46 = vadd.f32 %v3604_v44, %v3603_v42 }
 0x17b   : > { %1625 = vmatmul.f32.gmra.mxu0 %v1301_v55  ;;  %v1302_v16 = vand.u32 4294901760, %v1301_v55 }
 0x17c   : > { %v1013_v32 = vpop.f32.mrf.mxu0  ;;  %v1106_v40 = vpop.f32.mrf.mxu1 }
 0x17d   : > { %v1107_v41 = vadd.f32 %v1106_v40, %v1010_v0  ;;  %1744 = vmatmul.f32.gmra.mxu1 %v1302_v16  ;;  %v1303_v7 = vsub.f32 %v1301_v55, %v1302_v16  ;;  %v1014_v5 = vadd.f32 %v1013_v32, %v869_v62  ;;  %v767_v47 = vpop.f32.mrf.mxu2  ;;  %v763_v0 = vadd.f32 %v762_v33, %v639_v46 }
 0x17f   : > { %1202 = vst [vmem:[%s3274_s14 + $0x30] sm:$0xff] %v1107_v41  ;;  %v3320_v11 = vand.u32 4294901760, %v1107_v41  ;;  %v1304_v43 = vand.u32 4294901760, %v1303_v7  ;;  %v892_v40 = vpop.f32.mrf.mxu3  ;;  %v3605_v7 = vld [vmem:[#allocation14_spill] sm:$0xff] }
 0x181   : > { %1305 = vmatmul.f32.gmra.mxu2 %v1304_v43  ;;  %1510 = vmatmul.f32.gmra.mxu3 %v3320_v11  ;;  %v1309_v39 = vsub.f32 %v1107_v41, %v3320_v11  ;;  %v887_v41 = vadd.f32 %v886_v37, %v763_v0  ;;  %v3606_v43 = vld [vmem:[#allocation17_spill] sm:$0xff]  ;;  %v655_v0 = vadd.f32 %v3239_v45, %v3220_v49 }
 0x182   : > { %v643_v62 = vadd.f32 %v3606_v43, %v3605_v7  ;;  %v659_v45 = vadd.f32 %v3257_v24, %v3237_v36 }
 0x183   : > { %1630 = vmatmul.f32.gmra.mxu0 %v1309_v39  ;;  %v1310_v27 = vand.u32 4294901760, %v1309_v39 }
 0x184   : > { %v1017_v9 = vpop.f32.mrf.mxu0  ;;  %v1110_v19 = vpop.f32.mrf.mxu1 }
 0x185   : > { %v1111_v63 = vadd.f32 %v1110_v19, %v1014_v5  ;;  %1750 = vmatmul.f32.gmra.mxu1 %v1310_v27  ;;  %v1311_v10 = vsub.f32 %v1309_v39, %v1310_v27  ;;  %v1018_v57 = vadd.f32 %v1017_v9, %v875_v61  ;;  %v772_v31 = vpop.f32.mrf.mxu2  ;;  %v768_v27 = vadd.f32 %v767_v47, %v643_v62 }
 0x187   : > { %1203 = vst [vmem:[%s3274_s14 + $0x38] sm:$0xff] %v1111_v63  ;;  %v3327_v38 = vand.u32 4294901760, %v1111_v63  ;;  %v1312_v17 = vand.u32 4294901760, %v1311_v10  ;;  %v898_v10 = vpop.f32.mrf.mxu3  ;;  %v893_v33 = vadd.f32 %v892_v40, %v768_v27 }
 0x189   : > { %1313 = vmatmul.f32.gmra.mxu2 %v1312_v17  ;;  %1514 = vmatmul.f32.gmra.mxu3 %v3327_v38  ;;  %v1317_v56 = vsub.f32 %v1111_v63, %v3327_v38  ;;  %v3607_v17 = vld [vmem:[#allocation16_spill] sm:$0xff] }
 0x18a   : > { %v647_v61 = vadd.f32 %v3207_v3, %v3607_v17 }
 0x18b   : > { %1635 = vmatmul.f32.gmra.mxu0 %v1317_v56  ;;  %v1318_v25 = vand.u32 4294901760, %v1317_v56 }
 0x18c   : > { %v1021_v28 = vpop.f32.mrf.mxu0  ;;  %v1114_v12 = vpop.f32.mrf.mxu1 }
 0x18d   : > { %v1115_v18 = vadd.f32 %v1114_v12, %v1018_v57  ;;  %1756 = vmatmul.f32.gmra.mxu1 %v1318_v25  ;;  %v1319_v4 = vsub.f32 %v1317_v56, %v1318_v25  ;;  %v1022_v54 = vadd.f32 %v1021_v28, %v881_v13  ;;  %v773_v57 = vadd.f32 %v772_v31, %v647_v61  ;;  %v777_v12 = vpop.f32.mrf.mxu2 }
 0x18f   : > { %1204 = vst [vmem:[%s3274_s14 + $0x40] sm:$0xff] %v1115_v18  ;;  %v3334_v29 = vand.u32 4294901760, %v1115_v18  ;;  %v1320_v58 = vand.u32 4294901760, %v1319_v4  ;;  %v899_v3 = vadd.f32 %v898_v10, %v773_v57  ;;  %v651_v4 = vadd.f32 %v3222_v21, %v3205_v34  ;;  %v904_v13 = vpop.f32.mrf.mxu3 }
 0x191   : > { %1321 = vmatmul.f32.gmra.mxu2 %v1320_v58  ;;  %1518 = vmatmul.f32.gmra.mxu3 %v3334_v29  ;;  %v1325_v53 = vsub.f32 %v1115_v18, %v3334_v29 }
 0x193   : > { %1640 = vmatmul.f32.gmra.mxu0 %v1325_v53  ;;  %v1326_v30 = vand.u32 4294901760, %v1325_v53 }
 0x194   : > { %v1025_v1 = vpop.f32.mrf.mxu0  ;;  %v1118_v55 = vpop.f32.mrf.mxu1 }
 0x195   : > { %v1119_v16 = vadd.f32 %v1118_v55, %v1022_v54  ;;  %1762 = vmatmul.f32.gmra.mxu1 %v1326_v30  ;;  %v1327_v32 = vsub.f32 %v1325_v53, %v1326_v30  ;;  %v1026_v15 = vadd.f32 %v1025_v1, %v887_v41  ;;  %v778_v53 = vadd.f32 %v777_v12, %v651_v4  ;;  %v782_v34 = vpop.f32.mrf.mxu2 }
 0x196   : > { %v783_v7 = vadd.f32 %v782_v34, %v655_v0 }
 0x197   : > { %1205 = vst [vmem:[%s3274_s14 + $0x48] sm:$0xff] %v1119_v16  ;;  %v3341_v8 = vand.u32 4294901760, %v1119_v16  ;;  %v1328_v2 = vand.u32 4294901760, %v1327_v32  ;;  %v905_v21 = vadd.f32 %v904_v13, %v778_v53 }
 0x199   : > { %1329 = vmatmul.f32.gmra.mxu2 %v1328_v2  ;;  %1522 = vmatmul.f32.gmra.mxu3 %v3341_v8  ;;  %v1333_v26 = vsub.f32 %v1119_v16, %v3341_v8  ;;  %v910_v2 = vpop.f32.mrf.mxu3 }
 0x19a   : > { %v911_v49 = vadd.f32 %v910_v2, %v783_v7 }
 0x19b   : > { %1645 = vmatmul.f32.gmra.mxu0 %v1333_v26  ;;  %v1334_v50 = vand.u32 4294901760, %v1333_v26 }
 0x19c   : > { %v1029_v39 = vpop.f32.mrf.mxu0  ;;  %v1122_v5 = vpop.f32.mrf.mxu1 }
 0x19d   : > { %v1123_v9 = vadd.f32 %v1122_v5, %v1026_v15  ;;  %1768 = vmatmul.f32.gmra.mxu1 %v1334_v50  ;;  %v1335_v19 = vsub.f32 %v1333_v26, %v1334_v50  ;;  %v1030_v35 = vadd.f32 %v1029_v39, %v893_v33  ;;  %v787_v39 = vpop.f32.mrf.mxu2 }
 0x19f   : > { %1206 = vst [vmem:[%s3274_s14 + $0x50] sm:$0xff] %v1123_v9  ;;  %v3348_v52 = vand.u32 4294901760, %v1123_v9  ;;  %v1336_v63 = vand.u32 4294901760, %v1335_v19  ;;  %v788_v19 = vadd.f32 %v787_v39, %v659_v45 }
 0x1a1   : > { %1337 = vmatmul.f32.gmra.mxu2 %v1336_v63  ;;  %1526 = vmatmul.f32.gmra.mxu3 %v3348_v52  ;;  %v1341_v6 = vsub.f32 %v1123_v9, %v3348_v52  ;;  %v916_v33 = vpop.f32.mrf.mxu3 }
 0x1a2   : > { %v917_v61 = vadd.f32 %v916_v33, %v788_v19 }
 0x1a3   : > { %1650 = vmatmul.f32.gmra.mxu0 %v1341_v6  ;;  %v1342_v20 = vand.u32 4294901760, %v1341_v6 }
 0x1a4   : > { %v1033_v56 = vpop.f32.mrf.mxu0  ;;  %v1126_v37 = vpop.f32.mrf.mxu1 }
 0x1a5   : > { %v1127_v25 = vadd.f32 %v1126_v37, %v1030_v35  ;;  %1774 = vmatmul.f32.gmra.mxu1 %v1342_v20  ;;  %v1343_v28 = vsub.f32 %v1341_v6, %v1342_v20  ;;  %v1034_v42 = vadd.f32 %v1033_v56, %v899_v3 }
 0x1a7   : > { %1207 = vst [vmem:[%s3274_s14 + $0x58] sm:$0xff] %v1127_v25  ;;  %v3355_v48 = vand.u32 4294901760, %v1127_v25  ;;  %v1344_v18 = vand.u32 4294901760, %v1343_v28 }
 0x1a9   : > { %1345 = vmatmul.f32.gmra.mxu2 %v1344_v18  ;;  %1530 = vmatmul.f32.gmra.mxu3 %v3355_v48  ;;  %v1349_v58 = vsub.f32 %v1127_v25, %v3355_v48 }
 0x1ab   : > { %1655 = vmatmul.f32.gmra.mxu0 %v1349_v58  ;;  %v1350_v44 = vand.u32 4294901760, %v1349_v58 }
 0x1ac   : > { %v1037_v46 = vpop.f32.mrf.mxu0  ;;  %v1130_v47 = vpop.f32.mrf.mxu1 }
 0x1ad   : > { %v1131_v54 = vadd.f32 %v1130_v47, %v1034_v42  ;;  %1780 = vmatmul.f32.gmra.mxu1 %v1350_v44  ;;  %v1351_v30 = vsub.f32 %v1349_v58, %v1350_v44  ;;  %v1038_v32 = vadd.f32 %v1037_v46, %v905_v21 }
 0x1af   : > { %1208 = vst [vmem:[%s3274_s14 + $0x60] sm:$0xff] %v1131_v54  ;;  %v3362_v1 = vand.u32 4294901760, %v1131_v54  ;;  %v1352_v55 = vand.u32 4294901760, %v1351_v30 }
 0x1b1   : > { %1353 = vmatmul.f32.gmra.mxu2 %v1352_v55  ;;  %1534 = vmatmul.f32.gmra.mxu3 %v3362_v1  ;;  %v1357_v16 = vsub.f32 %v1131_v54, %v3362_v1 }
 0x1b3   : > { %1660 = vmatmul.f32.gmra.mxu0 %v1357_v16  ;;  %v1358_v40 = vand.u32 4294901760, %v1357_v16 }
 0x1b4   : > { %v1134_v41 = vpop.f32.mrf.mxu1  ;;  %v1041_v26 = vpop.f32.mrf.mxu0 }
 0x1b5   : > { %v1135_v43 = vadd.f32 %v1134_v41, %v1038_v32  ;;  %1786 = vmatmul.f32.gmra.mxu1 %v1358_v40  ;;  %v1359_v62 = vsub.f32 %v1357_v16, %v1358_v40  ;;  %v1042_v5 = vadd.f32 %v1041_v26, %v911_v49 }
 0x1b7   : > { %1209 = vst [vmem:[%s3274_s14 + $0x68] sm:$0xff] %v1135_v43  ;;  %v3369_v31 = vand.u32 4294901760, %v1135_v43  ;;  %v1360_v15 = vand.u32 4294901760, %v1359_v62 }
 0x1b9   : > { %1361 = vmatmul.f32.gmra.mxu2 %v1360_v15  ;;  %1538 = vmatmul.f32.gmra.mxu3 %v3369_v31  ;;  %v1365_v50 = vsub.f32 %v1135_v43, %v3369_v31 }
 0x1bb   : > { %1665 = vmatmul.f32.gmra.mxu0 %v1365_v50  ;;  %v1366_v27 = vand.u32 4294901760, %v1365_v50 }
 0x1bc   : > { %v1138_v9 = vpop.f32.mrf.mxu1  ;;  %v1045_v24 = vpop.f32.mrf.mxu0 }
 0x1bd   : > { %v1139_v63 = vadd.f32 %v1138_v9, %v1042_v5  ;;  %1792 = vmatmul.f32.gmra.mxu1 %v1366_v27  ;;  %v1367_v10 = vsub.f32 %v1365_v50, %v1366_v27  ;;  %v1046_v35 = vadd.f32 %v1045_v24, %v917_v61 }
 0x1bf   : > { %1210 = vst [vmem:[%s3274_s14 + $0x70] sm:$0xff] %v1139_v63  ;;  %v3376_v17 = vand.u32 4294901760, %v1139_v63  ;;  %v1368_v36 = vand.u32 4294901760, %v1367_v10 }
 0x1c1   : > { %1369 = vmatmul.f32.gmra.mxu2 %v1368_v36  ;;  %1542 = vmatmul.f32.gmra.mxu3 %v3376_v17  ;;  %v1373_v6 = vsub.f32 %v1139_v63, %v3376_v17 }
 0x1c3   : > { %1670 = vmatmul.f32.gmra.mxu0 %v1373_v6  ;;  %v1374_v20 = vand.u32 4294901760, %v1373_v6 }
 0x1c4   : > { %v1142_v56 = vpop.f32.mrf.mxu1 }
 0x1c5   : > { %v1143_v37 = vadd.f32 %v1142_v56, %v1046_v35  ;;  %1798 = vmatmul.f32.gmra.mxu1 %v1374_v20  ;;  %v1375_v57 = vsub.f32 %v1373_v6, %v1374_v20 }
 0x1c7   : > { %1211 = vst [vmem:[%s3274_s14 + $0x78] sm:$0xff] %v1143_v37  ;;  %v3381_v25 = vand.u32 4294901760, %v1143_v37  ;;  %v1376_v28 = vand.u32 4294901760, %v1375_v57 }
 0x1c9   : > { %1377 = vmatmul.f32.gmra.mxu2 %v1376_v28  ;;  %1546 = vmatmul.f32.gmra.mxu3 %v3381_v25  ;;  %v1381_v12 = vsub.f32 %v1143_v37, %v3381_v25 }
 0x1cb   : > { %1675 = vmatmul.f32.gmra.mxu0 %v1381_v12  ;;  %v1382_v18 = vand.u32 4294901760, %v1381_v12 }
 0x1cd   : > { %1804 = vmatmul.f32.gmra.mxu1 %v1382_v18  ;;  %v1383_v3 = vsub.f32 %v1381_v12, %v1382_v18 }
 0x1cf   : > { %v1384_v4 = vand.u32 4294901760, %v1383_v3 }
 0x1d0   : > { %v1601_v5 = vpop.f32.mrf.mxu0 }
 0x1d1   : > { %1385 = vmatmul.f32.gmra.mxu2 %v1384_v4  ;;  %1970 = vmatmul.f32.vlgmr.msra.gmra.mxu3 %v3277_v60 }
 0x1d4   : > { %v1487_v58 = vpop.f32.mrf.mxu3 }
 0x1d8   : > { %v1606_v63 = vpop.f32.mrf.mxu0 }
 0x1d9   : > { %1873 = vmatmul.f32.vlgmr.msra.gmra.mxu2 %v3277_v60  ;;  %1974 = vmatmul.f32.gmra.mxu3 %v3285_v51 }
 0x1dc   : > { %v1266_v13 = vpop.f32.mrf.mxu2  ;;  %v1491_v42 = vpop.f32.mrf.mxu3 }
 0x1dd   : > { %v3388_v44 = vadd.f32 %v1487_v58, %v1266_v13 }
 0x1df   : > { %v1602_v37 = vadd.f32 %v1601_v5, %v3388_v44 }
 0x1e1   : > { %1877 = vmatmul.f32.gmra.mxu2 %v3285_v51  ;;  %1978 = vmatmul.f32.gmra.mxu3 %v3292_v59 }
 0x1e4   : > { %v1274_v46 = vpop.f32.mrf.mxu2  ;;  %v1495_v47 = vpop.f32.mrf.mxu3 }
 0x1e5   : > { %v3392_v53 = vadd.f32 %v1491_v42, %v1274_v46 }
 0x1e9   : > { %1881 = vmatmul.f32.gmra.mxu2 %v3292_v59  ;;  %1982 = vmatmul.f32.gmra.mxu3 %v3299_v22 }
 0x1ec   : > { %v1282_v54 = vpop.f32.mrf.mxu2  ;;  %v1499_v60 = vpop.f32.mrf.mxu3 }
 0x1ed   : > { %v3396_v30 = vadd.f32 %v1495_v47, %v1282_v54 }
 0x1f1   : > { %1885 = vmatmul.f32.gmra.mxu2 %v3299_v22  ;;  %1986 = vmatmul.f32.gmra.mxu3 %v3306_v23 }
 0x1f4   : > { %v1290_v55 = vpop.f32.mrf.mxu2  ;;  %v1503_v51 = vpop.f32.mrf.mxu3 }
 0x1f5   : > { %v3400_v34 = vadd.f32 %v1499_v60, %v1290_v55 }
 0x1f9   : > { %1889 = vmatmul.f32.gmra.mxu2 %v3306_v23  ;;  %1990 = vmatmul.f32.gmra.mxu3 %v3313_v14 }
 0x1fc   : > { %v1298_v21 = vpop.f32.mrf.mxu2  ;;  %v1507_v59 = vpop.f32.mrf.mxu3 }
 0x1fd   : > { %v3404_v0 = vadd.f32 %v1503_v51, %v1298_v21 }
 0x201   : > { %1893 = vmatmul.f32.gmra.mxu2 %v3313_v14  ;;  %1994 = vmatmul.f32.gmra.mxu3 %v3320_v11 }
 0x204   : > { %v1306_v16 = vpop.f32.mrf.mxu2  ;;  %v1511_v22 = vpop.f32.mrf.mxu3 }
 0x205   : > { %v3408_v32 = vadd.f32 %v1507_v59, %v1306_v16 }
 0x209   : > { %1897 = vmatmul.f32.gmra.mxu2 %v3320_v11  ;;  %1998 = vmatmul.f32.gmra.mxu3 %v3327_v38 }
 0x20c   : > { %v1314_v40 = vpop.f32.mrf.mxu2  ;;  %v1515_v23 = vpop.f32.mrf.mxu3 }
 0x20d   : > { %v3412_v2 = vadd.f32 %v1511_v22, %v1314_v40 }
 0x211   : > { %1901 = vmatmul.f32.gmra.mxu2 %v3327_v38  ;;  %2002 = vmatmul.f32.gmra.mxu3 %v3334_v29 }
 0x214   : > { %v1322_v41 = vpop.f32.mrf.mxu2  ;;  %v1519_v14 = vpop.f32.mrf.mxu3 }
 0x215   : > { %v3416_v7 = vadd.f32 %v1515_v23, %v1322_v41 }
 0x219   : > { %1905 = vmatmul.f32.gmra.mxu2 %v3334_v29  ;;  %2006 = vmatmul.f32.gmra.mxu3 %v3341_v8 }
 0x21c   : > { %v1330_v43 = vpop.f32.mrf.mxu2  ;;  %v1523_v11 = vpop.f32.mrf.mxu3 }
 0x21d   : > { %v3420_v62 = vadd.f32 %v1519_v14, %v1330_v43 }
 0x221   : > { %1909 = vmatmul.f32.gmra.mxu2 %v3341_v8  ;;  %2010 = vmatmul.f32.gmra.mxu3 %v3348_v52 }
 0x224   : > { %v1338_v26 = vpop.f32.mrf.mxu2  ;;  %v1527_v38 = vpop.f32.mrf.mxu3 }
 0x225   : > { %v3424_v15 = vadd.f32 %v1523_v11, %v1338_v26 }
 0x229   : > { %1913 = vmatmul.f32.gmra.mxu2 %v3348_v52  ;;  %2014 = vmatmul.f32.gmra.mxu3 %v3355_v48  ;;  %v1715_v52 = vpop.f32.mrf.mxu1 }
 0x22c   : > { %v1346_v49 = vpop.f32.mrf.mxu2  ;;  %v1531_v29 = vpop.f32.mrf.mxu3 }
 0x22d   : > { %v3428_v45 = vadd.f32 %v1527_v38, %v1346_v49 }
 0x231   : > { %1917 = vmatmul.f32.gmra.mxu2 %v3355_v48  ;;  %2018 = vmatmul.f32.gmra.mxu3 %v3362_v1  ;;  %v1721_v33 = vpop.f32.mrf.mxu1 }
 0x234   : > { %v1354_v50 = vpop.f32.mrf.mxu2  ;;  %v1535_v8 = vpop.f32.mrf.mxu3 }
 0x235   : > { %v3432_v39 = vadd.f32 %v1531_v29, %v1354_v50 }
 0x239   : > { %1921 = vmatmul.f32.gmra.mxu2 %v3362_v1  ;;  %2022 = vmatmul.f32.gmra.mxu3 %v3369_v31  ;;  %v1611_v1 = vpop.f32.mrf.mxu0 }
 0x23c   : > { %v1362_v27 = vpop.f32.mrf.mxu2  ;;  %v1539_v9 = vpop.f32.mrf.mxu3 }
 0x23d   : > { %v3436_v19 = vadd.f32 %v1535_v8, %v1362_v27 }
 0x241   : > { %1925 = vmatmul.f32.gmra.mxu2 %v3369_v31  ;;  %2026 = vmatmul.f32.gmra.mxu3 %v3376_v17  ;;  %v1727_v31 = vpop.f32.mrf.mxu1 }
 0x244   : > { %v1370_v48 = vpop.f32.mrf.mxu2  ;;  %v1543_v10 = vpop.f32.mrf.mxu3 }
 0x245   : > { %v3440_v36 = vadd.f32 %v1539_v9, %v1370_v48 }
 0x249   : > { %1929 = vmatmul.f32.gmra.mxu2 %v3376_v17  ;;  %2030 = vmatmul.f32.gmra.mxu3 %v3381_v25  ;;  %v1616_v17 = vpop.f32.mrf.mxu0  ;;  %v1733_v57 = vpop.f32.mrf.mxu1 }
 0x24c   : > { %v1378_v24 = vpop.f32.mrf.mxu2  ;;  %v1547_v61 = vpop.f32.mrf.mxu3 }
 0x24d   : > { %v3444_v6 = vadd.f32 %v1543_v10, %v1378_v24 }
 0x251   : > { %1933 = vmatmul.f32.gmra.mxu2 %v3381_v25  ;;  %v1716_v25 = vadd.f32 %v1715_v52, %v1602_v37 }
 0x254   : > { %v1386_v35 = vpop.f32.mrf.mxu2  ;;  %v1971_v20 = vpop.f32.mrf.mxu3 }
 0x255   : > { %v3450_v56 = vadd.f32 %v1547_v61, %v1386_v35 }
 0x256   : > { %2342 = shalt.err (!%p2339_p0)
}
 0x257   : > { %s2401_s24 = smov 128   ;;  %s2402_s26 = smov 8   ;;  %vm2034_vm0 = vcmask 15360   ;;  %v1607_v3 = vadd.f32 %v1606_v63, %v3392_v53  ;;  %v1621_v4 = vpop.f32.mrf.mxu0  ;;  %v1739_v13 = vpop.f32.mrf.mxu1  ;;  %v1612_v54 = vadd.f32 %v1611_v1, %v3396_v30  ;;  %v1617_v22 = vadd.f32 %v1616_v17, %v3400_v34 }
 0x258   : > { %2221 = dma.vmem_to_hbm [thread:$0]  (%p2479_p9), %s2070_s7, 2048, %s2072_s8, %s2052_s10, %s2401_s24, %s2401_s24, %s2402_s26   ;;  %v1622_v11 = vadd.f32 %v1621_v4, %v3404_v0 }
 0x259   : > { %s3473_s6 = scalar_lea.vmem %s3549_s4, %s2211_s9  ;;  %v1722_v42 = vadd.f32 %v1721_v33, %v1607_v3  ;;  %v1728_v51 = vadd.f32 %v1727_v31, %v1612_v54  ;;  %v1734_v41 = vadd.f32 %v1733_v57, %v1617_v22 }
 0x25a   : > { %v1740_v49 = vadd.f32 %v1739_v13, %v1622_v11 }
 0x25c   : > { %v1874_v28 = vpop.f32.mrf.mxu2  ;;  %v1975_v12 = vpop.f32.mrf.mxu3 }
 0x25d   : > { %v1875_v18 = vadd.f32 %v1874_v28, %v1716_v25 }
 0x25f   : > { %v1972_v58 = vadd.f32 %v1971_v20, %v1875_v18  ;;  %v1626_v55 = vpop.f32.mrf.mxu0  ;;  %v1745_v59 = vpop.f32.mrf.mxu1 }
 0x260   : > { %v1627_v5 = vadd.f32 %v1626_v55, %v3408_v32 }
 0x261   : > { %2035 = vst.msk [vmem:[%s3473_s6] sm:$0xff] %vm2034_vm0, %v1972_v58 }
 0x262   : > { %v1746_v9 = vadd.f32 %v1745_v59, %v1627_v5 }
 0x264   : > { %v1878_v44 = vpop.f32.mrf.mxu2  ;;  %v1979_v46 = vpop.f32.mrf.mxu3 }
 0x265   : > { %v1879_v47 = vadd.f32 %v1878_v44, %v1722_v42 }
 0x267   : > { %v1976_v60 = vadd.f32 %v1975_v12, %v1879_v47  ;;  %v1631_v23 = vpop.f32.mrf.mxu0  ;;  %v1751_v26 = vpop.f32.mrf.mxu1 }
 0x268   : > { %v1632_v10 = vadd.f32 %v1631_v23, %v3412_v2 }
 0x269   : > { %2036 = vst.msk [vmem:[%s3473_s6 + $0x8] sm:$0xff] %vm2034_vm0, %v1976_v60 }
 0x26a   : > { %v1752_v61 = vadd.f32 %v1751_v26, %v1632_v10 }
 0x26c   : > { %v1882_v21 = vpop.f32.mrf.mxu2  ;;  %v1983_v53 = vpop.f32.mrf.mxu3 }
 0x26d   : > { %v1883_v16 = vadd.f32 %v1882_v21, %v1728_v51 }
 0x26f   : > { %v1980_v40 = vadd.f32 %v1979_v46, %v1883_v16  ;;  %v1636_v34 = vpop.f32.mrf.mxu0  ;;  %v1757_v27 = vpop.f32.mrf.mxu1 }
 0x270   : > { %v1637_v20 = vadd.f32 %v1636_v34, %v3416_v7 }
 0x271   : > { %2037 = vst.msk [vmem:[%s3473_s6 + $0x10] sm:$0xff] %vm2034_vm0, %v1980_v40 }
 0x272   : > { %v1758_v57 = vadd.f32 %v1757_v27, %v1637_v20 }
 0x274   : > { %v1886_v14 = vpop.f32.mrf.mxu2  ;;  %v1987_v30 = vpop.f32.mrf.mxu3 }
 0x275   : > { %v1887_v43 = vadd.f32 %v1886_v14, %v1734_v41 }
 0x277   : > { %v1984_v38 = vadd.f32 %v1983_v53, %v1887_v43  ;;  %v1641_v33 = vpop.f32.mrf.mxu0  ;;  %v1763_v24 = vpop.f32.mrf.mxu1 }
 0x278   : > { %v1642_v18 = vadd.f32 %v1641_v33, %v3420_v62 }
 0x279   : > { %2038 = vst.msk [vmem:[%s3473_s6 + $0x18] sm:$0xff] %vm2034_vm0, %v1984_v38 }
 0x27a   : > { %v1764_v58 = vadd.f32 %v1763_v24, %v1642_v18 }
 0x27c   : > { %v1890_v29 = vpop.f32.mrf.mxu2  ;;  %v1991_v50 = vpop.f32.mrf.mxu3 }
 0x27d   : > { %v1891_v8 = vadd.f32 %v1890_v29, %v1740_v49 }
 0x27f   : > { %v1988_v52 = vadd.f32 %v1987_v30, %v1891_v8  ;;  %v1646_v37 = vpop.f32.mrf.mxu0  ;;  %v1769_v12 = vpop.f32.mrf.mxu1 }
 0x280   : > { %v1647_v44 = vadd.f32 %v1646_v37, %v3424_v15 }
 0x281   : > { %2039 = vst.msk [vmem:[%s3473_s6 + $0x20] sm:$0xff] %vm2034_vm0, %v1988_v52 }
 0x282   : > { %v1770_v54 = vadd.f32 %v1769_v12, %v1647_v44 }
 0x284   : > { %v1894_v63 = vpop.f32.mrf.mxu2  ;;  %v1995_v0 = vpop.f32.mrf.mxu3 }
 0x285   : > { %v1895_v48 = vadd.f32 %v1894_v63, %v1746_v9 }
 0x287   : > { %v1992_v1 = vadd.f32 %v1991_v50, %v1895_v48  ;;  %v1651_v4 = vpop.f32.mrf.mxu0  ;;  %v1775_v47 = vpop.f32.mrf.mxu1 }
 0x288   : > { %v1652_v21 = vadd.f32 %v1651_v4, %v3428_v45 }
 0x289   : > { %2040 = vst.msk [vmem:[%s3473_s6 + $0x28] sm:$0xff] %vm2034_vm0, %v1992_v1 }
 0x28a   : > { %v1776_v16 = vadd.f32 %v1775_v47, %v1652_v21 }
 0x28c   : > { %v1898_v31 = vpop.f32.mrf.mxu2  ;;  %v1999_v32 = vpop.f32.mrf.mxu3 }
 0x28d   : > { %v1899_v35 = vadd.f32 %v1898_v31, %v1752_v61 }
 0x28f   : > { %v1996_v17 = vadd.f32 %v1995_v0, %v1899_v35  ;;  %v1656_v51 = vpop.f32.mrf.mxu0  ;;  %v1781_v59 = vpop.f32.mrf.mxu1 }
 0x290   : > { %v1657_v23 = vadd.f32 %v1656_v51, %v3432_v39 }
 0x291   : > { %2041 = vst.msk [vmem:[%s3473_s6 + $0x30] sm:$0xff] %vm2034_vm0, %v1996_v17 }
 0x292   : > { %v1782_v30 = vadd.f32 %v1781_v59, %v1657_v23 }
 0x294   : > { %v1902_v25 = vpop.f32.mrf.mxu2  ;;  %v2003_v2 = vpop.f32.mrf.mxu3 }
 0x295   : > { %v1903_v28 = vadd.f32 %v1902_v25, %v1758_v57 }
 0x297   : > { %v2000_v3 = vadd.f32 %v1999_v32, %v1903_v28  ;;  %v1661_v14 = vpop.f32.mrf.mxu0  ;;  %v1787_v43 = vpop.f32.mrf.mxu1 }
 0x298   : > { %v1662_v26 = vadd.f32 %v1661_v14, %v3436_v19 }
 0x299   : > { %2042 = vst.msk [vmem:[%s3473_s6 + $0x38] sm:$0xff] %vm2034_vm0, %v2000_v3 }
 0x29a   : > { %v1788_v50 = vadd.f32 %v1787_v43, %v1662_v26 }
 0x29c   : > { %v1906_v13 = vpop.f32.mrf.mxu2  ;;  %v2007_v7 = vpop.f32.mrf.mxu3 }
 0x29d   : > { %v1907_v42 = vadd.f32 %v1906_v13, %v1764_v58 }
 0x29f   : > { %v2004_v46 = vadd.f32 %v2003_v2, %v1907_v42  ;;  %v1666_v29 = vpop.f32.mrf.mxu0  ;;  %v1793_v8 = vpop.f32.mrf.mxu1 }
 0x2a0   : > { %v1667_v5 = vadd.f32 %v1666_v29, %v3440_v36 }
 0x2a1   : > { %2043 = vst.msk [vmem:[%s3473_s6 + $0x40] sm:$0xff] %vm2034_vm0, %v2004_v46 }
 0x2a2   : > { %v1794_v9 = vadd.f32 %v1793_v8, %v1667_v5 }
 0x2a4   : > { %v1910_v60 = vpop.f32.mrf.mxu2  ;;  %v2011_v55 = vpop.f32.mrf.mxu3 }
 0x2a5   : > { %v1911_v62 = vadd.f32 %v1910_v60, %v1770_v54 }
 0x2a7   : > { %v2008_v53 = vadd.f32 %v2007_v7, %v1911_v62  ;;  %v1671_v63 = vpop.f32.mrf.mxu0  ;;  %v1799_v33 = vpop.f32.mrf.mxu1 }
 0x2a8   : > { %v1672_v48 = vadd.f32 %v1671_v63, %v3444_v6 }
 0x2a9   : > { %2044 = vst.msk [vmem:[%s3473_s6 + $0x48] sm:$0xff] %vm2034_vm0, %v2008_v53 }
 0x2aa   : > { %v1800_v1 = vadd.f32 %v1799_v33, %v1672_v48 }
 0x2ac   : > { %v1914_v22 = vpop.f32.mrf.mxu2  ;;  %v2015_v40 = vpop.f32.mrf.mxu3 }
 0x2ad   : > { %v1915_v15 = vadd.f32 %v1914_v22, %v1776_v16 }
 0x2af   : > { %v2012_v41 = vadd.f32 %v2011_v55, %v1915_v15  ;;  %v1676_v31 = vpop.f32.mrf.mxu0  ;;  %v1805_v20 = vpop.f32.mrf.mxu1 }
 0x2b0   : > { %v1677_v32 = vadd.f32 %v1676_v31, %v3450_v56 }
 0x2b1   : > { %2045 = vst.msk [vmem:[%s3473_s6 + $0x50] sm:$0xff] %vm2034_vm0, %v2012_v41 }
 0x2b2   : > { %v1806_v17 = vadd.f32 %v1805_v20, %v1677_v32 }
 0x2b4   : > { %v1918_v11 = vpop.f32.mrf.mxu2  ;;  %v2019_v49 = vpop.f32.mrf.mxu3 }
 0x2b5   : > { %v1919_v45 = vadd.f32 %v1918_v11, %v1782_v30 }
 0x2b7   : > { %v2016_v38 = vadd.f32 %v2015_v40, %v1919_v45 }
 0x2b9   : > { %2046 = vst.msk [vmem:[%s3473_s6 + $0x58] sm:$0xff] %vm2034_vm0, %v2016_v38 }
 0x2bc   : > { %v1922_v34 = vpop.f32.mrf.mxu2  ;;  %v2023_v27 = vpop.f32.mrf.mxu3 }
 0x2bd   : > { %v1923_v39 = vadd.f32 %v1922_v34, %v1788_v50 }
 0x2bf   : > { %v2020_v52 = vadd.f32 %v2019_v49, %v1923_v39 }
 0x2c1   : > { %2047 = vst.msk [vmem:[%s3473_s6 + $0x60] sm:$0xff] %vm2034_vm0, %v2020_v52 }
 0x2c4   : > { %v1926_v19 = vpop.f32.mrf.mxu2  ;;  %v2027_v24 = vpop.f32.mrf.mxu3 }
 0x2c5   : > { %v1927_v0 = vadd.f32 %v1926_v19, %v1794_v9 }
 0x2c7   : > { %v2024_v10 = vadd.f32 %v2023_v27, %v1927_v0 }
 0x2c9   : > { %2048 = vst.msk [vmem:[%s3473_s6 + $0x68] sm:$0xff] %vm2034_vm0, %v2024_v10 }
 0x2cc   : > { %v1930_v61 = vpop.f32.mrf.mxu2  ;;  %v2031_v6 = vpop.f32.mrf.mxu3 }
 0x2cd   : > { %v1931_v36 = vadd.f32 %v1930_v61, %v1800_v1 }
 0x2cf   : > { %v2028_v35 = vadd.f32 %v2027_v24, %v1931_v36 }
 0x2d1   : > { %2049 = vst.msk [vmem:[%s3473_s6 + $0x70] sm:$0xff] %vm2034_vm0, %v2028_v35 }
 0x2d4   : > { %v1934_v37 = vpop.f32.mrf.mxu2 }
 0x2d5   : > { %v1935_v57 = vadd.f32 %v1934_v37, %v1806_v17 }
 0x2d7   : > { %v2032_v25 = vadd.f32 %v2031_v6, %v1935_v57 }
 0x2d9   : > { %2050 = vst.msk [vmem:[%s3473_s6 + $0x78] sm:$0xff] %vm2034_vm0, %v2032_v25 }
 0x2da PF: > { %s2090_s28 = sand.u32 1, %s2377_s15   ;;  %p2228_p9 = pnand %p2203_p12, %p2486_p11 }
 0x2db   : > { %s2091_s5 = scalar_lea.sflag [#allocation5], %s2090_s28 }
 0x2dc   : > { %p2229_p1 = pneg %p2228_p9 }
 0x2de   : > { %2372 = dma.done.wait (%p2229_p1), %s2091_s5, 2048  }
 0x2df   : > { %2374 = vsyncadd (%p2229_p1), %s2091_s5, 4294965248  ;;  %s21_s20 = sadd.s32 1, %s2397_s20   ;;  %s3608_s15 = smov %s2381_s16 }
 0x2e0   : > { %p18_p2 = scmp.ge.s32.totalorder %s21_s20, 4   ;;  %s3609_s16 = smov %s2385_s17 }
 0x2e1   : > { %s3610_s17 = smov %s2484_s29  ;;  %s3611_s18 = smov %s2393_s19 }
 0x2e2   : > { %s3612_s19 = smov %s3614_s23  ;;  %20 = sbr.rel (!%p18_p2) target bundleno = 6 (0x6), region = 100 }
 0x2e7   :  { %2105 = vsyncpa [#allocation4], 1 }
 0x2e8   :  { %2107 = vsyncpa [#allocation4 + $0x1], 1 }
 0x2e9   :  { %2108 = vsyncpa [#allocation5], 1 }
 0x2ea   :  { %2110 = vsyncpa [#allocation5 + $0x1], 1 }

</bundles_post_ra>
